<compile_context>
chip_gen: v7x
topology: tpu7x:2x2x1
jax: 0.10.0
libtpu: 0.0.40
codegen_flags: <defaults>
</compile_context>

<pallas_src>
import functools

import jax
import jax.numpy as jnp
from jax.experimental import pallas as pl
from jax.experimental.pallas import tpu as pltpu


def _conv_bn_lrelu_kernel(x_ref, w_ref, scale_ref, bias_ref, o_ref, *,
                          K, Ho, Wo, stride, use_bf16):
    """One batch element per grid step.

    x_ref:     (1, Hp, Wp, Cin)    zero-padded NHWC input image
    w_ref:     (K*K, Cin, Cout_p)  per-tap weight matrices (lane-padded Cout)
    scale_ref: (1, Cout_p)         folded BN scale  = gamma / sqrt(var + eps)
    bias_ref:  (1, Cout_p)         folded BN bias   = beta - mean * scale
    o_ref:     (1, Ho*Wo, Cout_p)  lane-dense output slab
    """
    Cin = x_ref.shape[-1]
    Cout_p = w_ref.shape[-1]
    M = Ho * Wo

    acc = jnp.zeros((M, Cout_p), jnp.float32)
    # On-the-fly im2col: unrolled K*K tap loop, each tap is a shifted window of
    # the padded image contracted over Cin on the MXU, accumulated in f32.
    for kh in range(K):
        for kw in range(K):
            if stride == 1:
                xs = x_ref[0, kh:kh + Ho, kw:kw + Wo, :]
            else:
                # TODO(synk): strided window load; not exercised by the test below.
                xs = x_ref[0, pl.ds(kh, Ho, stride), pl.ds(kw, Wo, stride), :]
            xs = xs.reshape(M, Cin)
            w = w_ref[kh * K + kw]                          # (Cin, Cout_p)
            if use_bf16:
                xs = xs.astype(jnp.bfloat16)
                w = w.astype(jnp.bfloat16)
            acc = acc + jnp.dot(xs, w, preferred_element_type=jnp.float32)

    y = acc * scale_ref[...] + bias_ref[...]                # folded eval-mode BN
    y = jnp.maximum(y, 0.1 * y)                             # LeakyReLU(0.1)
    o_ref[0] = y.astype(o_ref.dtype)                        # unmasked lane-dense store


def conv_layer_pallas(x_nchw, weight, gamma, beta, running_mean, running_var,
                      *, stride=1, padding=1, eps=1e-5, use_bf16=False):
    """Fused Conv2d(bias=False) + BatchNorm2d(eval) + LeakyReLU(0.1).

    x_nchw: (N, Cin, H, W) float32, weight: (Cout, Cin, K, K) float32.
    Returns (N, Cout, Ho, Wo) float32 (matches PyTorch ConvLayer forward).
    """
    N, Cin, H, W = x_nchw.shape
    Cout, _, K, _ = weight.shape
    Ho = (H + 2 * padding - K) // stride + 1
    Wo = (W + 2 * padding - K) // stride + 1
    Hp, Wp = H + 2 * padding, W + 2 * padding
    Cout_p = ((Cout + 127) // 128) * 128        # lane-dense output stores

    # ---- layout glue (plain JAX; no im2col materialization) ----
    x = jnp.transpose(x_nchw, (0, 2, 3, 1)).astype(jnp.float32)       # NHWC
    x_pad = jnp.pad(x, ((0, 0), (padding, padding), (padding, padding), (0, 0)))

    # (Cout, Cin, K, K) -> (K*K, Cin, Cout_p): tap-major, Cin on contraction,
    # Cout padded to the lane width.
    w_mat = jnp.transpose(weight, (2, 3, 1, 0)).reshape(K * K, Cin, Cout)
    w_mat = jnp.pad(w_mat, ((0, 0), (0, 0), (0, Cout_p - Cout))).astype(jnp.float32)

    # Fold eval-mode BN into per-channel affine (padded lanes -> 0).
    scale = gamma / jnp.sqrt(running_var + eps)
    bias = beta - running_mean * scale
    scale2d = jnp.pad(scale.astype(jnp.float32), (0, Cout_p - Cout)).reshape(1, Cout_p)
    bias2d = jnp.pad(bias.astype(jnp.float32), (0, Cout_p - Cout)).reshape(1, Cout_p)

    kernel = functools.partial(_conv_bn_lrelu_kernel, K=K, Ho=Ho, Wo=Wo,
                               stride=stride, use_bf16=use_bf16)

    # VMEM budget: blocks (double-buffered by the pipeline) + f32 accumulator,
    # with headroom, capped below v7x physical VMEM (64 MiB).
    block_bytes = 4 * (Hp * Wp * Cin              # input image block
                       + K * K * Cin * Cout_p     # weights
                       + 2 * Cout_p               # scale + bias
                       + 2 * Ho * Wo * Cout_p)    # output block + accumulator
    vmem_limit = int(min(max(4 * block_bytes, 8 * 1024 * 1024), 64 * 1024 * 1024))

    out = pl.pallas_call(
        kernel,
        out_shape=jax.ShapeDtypeStruct((N, Ho * Wo, Cout_p), jnp.float32),
        grid_spec=pltpu.PrefetchScalarGridSpec(
            num_scalar_prefetch=0,
            grid=(N,),
            in_specs=[
                pl.BlockSpec((1, Hp, Wp, Cin), lambda n: (n, 0, 0, 0)),
                pl.BlockSpec((K * K, Cin, Cout_p), lambda n: (0, 0, 0)),
                pl.BlockSpec((1, Cout_p), lambda n: (0, 0)),
                pl.BlockSpec((1, Cout_p), lambda n: (0, 0)),
            ],
            out_specs=pl.BlockSpec((1, Ho * Wo, Cout_p), lambda n: (n, 0, 0)),
        ),
        compiler_params=pltpu.CompilerParams(
            dimension_semantics=("parallel",),
            vmem_limit_bytes=vmem_limit),
    )(x_pad, w_mat, scale2d, bias2d)

    # Slice off lane padding, back to NCHW (XLA fuses slice+reshape+transpose).
    out = out[:, :, :Cout].reshape(N, Ho, Wo, Cout)
    return jnp.transpose(out, (0, 3, 1, 2))


def reference(x_nchw, weight, gamma, beta, running_mean, running_var,
              *, stride=1, padding=1, eps=1e-5):
    y = jax.lax.conv_general_dilated(
        x_nchw, weight, window_strides=(stride, stride),
        padding=[(padding, padding), (padding, padding)],
        dimension_numbers=("NCHW", "OIHW", "NCHW"))
    scale = (gamma / jnp.sqrt(running_var + eps)).reshape(1, -1, 1, 1)
    bias = (beta - running_mean * gamma / jnp.sqrt(running_var + eps)).reshape(1, -1, 1, 1)
    y = y * scale + bias
    return jnp.where(y > 0, y, 0.1 * y)


if __name__ == "__main__":
    key = jax.random.PRNGKey(0)
    k1, k2, k3, k4, k5, k6 = jax.random.split(key, 6)

    N, Cin, H, W = 2, 4, 16, 16
    Cout, K = 8, 3

    x = jax.random.normal(k1, (N, Cin, H, W), dtype=jnp.float32)
    weight = 0.1 * jax.random.normal(k2, (Cout, Cin, K, K), dtype=jnp.float32)
    gamma = 1.0 + 0.1 * jax.random.normal(k3, (Cout,), dtype=jnp.float32)
    beta = 0.1 * jax.random.normal(k4, (Cout,), dtype=jnp.float32)
    running_mean = 0.1 * jax.random.normal(k5, (Cout,), dtype=jnp.float32)
    running_var = jnp.abs(1.0 + 0.1 * jax.random.normal(k6, (Cout,), dtype=jnp.float32))

    fn = functools.partial(conv_layer_pallas, stride=1, padding=1)
    out = jax.block_until_ready(fn(x, weight, gamma, beta, running_mean, running_var))

    ref = reference(x, weight, gamma, beta, running_mean, running_var)
    assert out.shape == (N, Cout, H, W), out.shape
    assert jnp.allclose(out, ref, atol=1e-4, rtol=1e-4), float(jnp.max(jnp.abs(out - ref)))

    print("KERNEL_OK")
</pallas_src>

<mosaic_0001>
module attributes {stable_mosaic.version = 11 : i64} {
  func.func @_conv_bn_lrelu_kernel(%arg0: i32, %arg1: memref<1x18x18x4xf32, #tpu.memory_space<vmem>>, %arg2: memref<9x4x128xf32, #tpu.memory_space<vmem>>, %arg3: memref<1x128xf32, #tpu.memory_space<vmem>>, %arg4: memref<1x128xf32, #tpu.memory_space<vmem>>, %arg5: memref<1x256x128xf32, #tpu.memory_space<vmem>>) attributes {dimension_semantics = [#tpu.dimension_semantics<parallel>], iteration_bounds = array<i64: 2>, scalar_prefetch = 0 : i64, scratch_operands = 0 : i64, tpu.core_type = #tpu.core_type<tc>, window_params = [{transform_indices = @transform_0, window_bounds = array<i64: 1, 18, 18, 4>}, {pipeline_mode = #tpu.pipeline_mode<synchronous>, transform_indices = @transform_1, window_bounds = array<i64: 9, 4, 128>}, {pipeline_mode = #tpu.pipeline_mode<synchronous>, transform_indices = @transform_2, window_bounds = array<i64: 1, 128>}, {pipeline_mode = #tpu.pipeline_mode<synchronous>, transform_indices = @transform_3, window_bounds = array<i64: 1, 128>}, {transform_indices = @transform_4, window_bounds = array<i64: 1, 256, 128>}]} {
    %cst = arith.constant 0.000000e+00 : f32
    %0 = vector.broadcast %cst : f32 to vector<256x128xf32>
    %c0 = arith.constant 0 : index
    %c0_0 = arith.constant 0 : index
    %c0_1 = arith.constant 0 : index
    %c0_2 = arith.constant 0 : index
    %1 = vector.load %arg1[%c0, %c0_0, %c0_1, %c0_2] : memref<1x18x18x4xf32, #tpu.memory_space<vmem>>, vector<1x16x16x4xf32>
    %2 = vector.shape_cast %1 : vector<1x16x16x4xf32> to vector<16x16x4xf32>
    %3 = vector.shape_cast %2 : vector<16x16x4xf32> to vector<256x4xf32>
    %c0_3 = arith.constant 0 : index
    %c0_4 = arith.constant 0 : index
    %c0_5 = arith.constant 0 : index
    %4 = vector.load %arg2[%c0_3, %c0_4, %c0_5] : memref<9x4x128xf32, #tpu.memory_space<vmem>>, vector<1x4x128xf32>
    %5 = vector.shape_cast %4 : vector<1x4x128xf32> to vector<4x128xf32>
    %cst_6 = arith.constant dense<0.000000e+00> : vector<256x128xf32>
    %6 = tpu.matmul %3, %5, %cst_6 {dimension_numbers = #tpu.dot_dimension_numbers<[1], [0], [0], [1], [0, 0, 1, 1], [], []>} : vector<256x4xf32>, vector<4x128xf32>, vector<256x128xf32> -> vector<256x128xf32>
    %7 = arith.addf %0, %6 : vector<256x128xf32>
    %c0_7 = arith.constant 0 : index
    %c0_8 = arith.constant 0 : index
    %c1 = arith.constant 1 : index
    %c0_9 = arith.constant 0 : index
    %8 = vector.load %arg1[%c0_7, %c0_8, %c1, %c0_9] : memref<1x18x18x4xf32, #tpu.memory_space<vmem>>, vector<1x16x16x4xf32>
    %9 = vector.shape_cast %8 : vector<1x16x16x4xf32> to vector<16x16x4xf32>
    %10 = vector.shape_cast %9 : vector<16x16x4xf32> to vector<256x4xf32>
    %c1_10 = arith.constant 1 : index
    %c0_11 = arith.constant 0 : index
    %c0_12 = arith.constant 0 : index
    %11 = vector.load %arg2[%c1_10, %c0_11, %c0_12] : memref<9x4x128xf32, #tpu.memory_space<vmem>>, vector<1x4x128xf32>
    %12 = vector.shape_cast %11 : vector<1x4x128xf32> to vector<4x128xf32>
    %cst_13 = arith.constant dense<0.000000e+00> : vector<256x128xf32>
    %13 = tpu.matmul %10, %12, %cst_13 {dimension_numbers = #tpu.dot_dimension_numbers<[1], [0], [0], [1], [0, 0, 1, 1], [], []>} : vector<256x4xf32>, vector<4x128xf32>, vector<256x128xf32> -> vector<256x128xf32>
    %14 = arith.addf %7, %13 : vector<256x128xf32>
    %c0_14 = arith.constant 0 : index
    %c0_15 = arith.constant 0 : index
    %c2 = arith.constant 2 : index
    %c0_16 = arith.constant 0 : index
    %15 = vector.load %arg1[%c0_14, %c0_15, %c2, %c0_16] : memref<1x18x18x4xf32, #tpu.memory_space<vmem>>, vector<1x16x16x4xf32>
    %16 = vector.shape_cast %15 : vector<1x16x16x4xf32> to vector<16x16x4xf32>
    %17 = vector.shape_cast %16 : vector<16x16x4xf32> to vector<256x4xf32>
    %c2_17 = arith.constant 2 : index
    %c0_18 = arith.constant 0 : index
    %c0_19 = arith.constant 0 : index
    %18 = vector.load %arg2[%c2_17, %c0_18, %c0_19] : memref<9x4x128xf32, #tpu.memory_space<vmem>>, vector<1x4x128xf32>
    %19 = vector.shape_cast %18 : vector<1x4x128xf32> to vector<4x128xf32>
    %cst_20 = arith.constant dense<0.000000e+00> : vector<256x128xf32>
    %20 = tpu.matmul %17, %19, %cst_20 {dimension_numbers = #tpu.dot_dimension_numbers<[1], [0], [0], [1], [0, 0, 1, 1], [], []>} : vector<256x4xf32>, vector<4x128xf32>, vector<256x128xf32> -> vector<256x128xf32>
    %21 = arith.addf %14, %20 : vector<256x128xf32>
    %c0_21 = arith.constant 0 : index
    %c1_22 = arith.constant 1 : index
    %c0_23 = arith.constant 0 : index
    %c0_24 = arith.constant 0 : index
    %22 = vector.load %arg1[%c0_21, %c1_22, %c0_23, %c0_24] : memref<1x18x18x4xf32, #tpu.memory_space<vmem>>, vector<1x16x16x4xf32>
    %23 = vector.shape_cast %22 : vector<1x16x16x4xf32> to vector<16x16x4xf32>
    %24 = vector.shape_cast %23 : vector<16x16x4xf32> to vector<256x4xf32>
    %c3 = arith.constant 3 : index
    %c0_25 = arith.constant 0 : index
    %c0_26 = arith.constant 0 : index
    %25 = vector.load %arg2[%c3, %c0_25, %c0_26] : memref<9x4x128xf32, #tpu.memory_space<vmem>>, vector<1x4x128xf32>
    %26 = vector.shape_cast %25 : vector<1x4x128xf32> to vector<4x128xf32>
    %cst_27 = arith.constant dense<0.000000e+00> : vector<256x128xf32>
    %27 = tpu.matmul %24, %26, %cst_27 {dimension_numbers = #tpu.dot_dimension_numbers<[1], [0], [0], [1], [0, 0, 1, 1], [], []>} : vector<256x4xf32>, vector<4x128xf32>, vector<256x128xf32> -> vector<256x128xf32>
    %28 = arith.addf %21, %27 : vector<256x128xf32>
    %c0_28 = arith.constant 0 : index
    %c1_29 = arith.constant 1 : index
    %c1_30 = arith.constant 1 : index
    %c0_31 = arith.constant 0 : index
    %29 = vector.load %arg1[%c0_28, %c1_29, %c1_30, %c0_31] : memref<1x18x18x4xf32, #tpu.memory_space<vmem>>, vector<1x16x16x4xf32>
    %30 = vector.shape_cast %29 : vector<1x16x16x4xf32> to vector<16x16x4xf32>
    %31 = vector.shape_cast %30 : vector<16x16x4xf32> to vector<256x4xf32>
    %c4 = arith.constant 4 : index
    %c0_32 = arith.constant 0 : index
    %c0_33 = arith.constant 0 : index
    %32 = vector.load %arg2[%c4, %c0_32, %c0_33] : memref<9x4x128xf32, #tpu.memory_space<vmem>>, vector<1x4x128xf32>
    %33 = vector.shape_cast %32 : vector<1x4x128xf32> to vector<4x128xf32>
    %cst_34 = arith.constant dense<0.000000e+00> : vector<256x128xf32>
    %34 = tpu.matmul %31, %33, %cst_34 {dimension_numbers = #tpu.dot_dimension_numbers<[1], [0], [0], [1], [0, 0, 1, 1], [], []>} : vector<256x4xf32>, vector<4x128xf32>, vector<256x128xf32> -> vector<256x128xf32>
    %35 = arith.addf %28, %34 : vector<256x128xf32>
    %c0_35 = arith.constant 0 : index
    %c1_36 = arith.constant 1 : index
    %c2_37 = arith.constant 2 : index
    %c0_38 = arith.constant 0 : index
    %36 = vector.load %arg1[%c0_35, %c1_36, %c2_37, %c0_38] : memref<1x18x18x4xf32, #tpu.memory_space<vmem>>, vector<1x16x16x4xf32>
    %37 = vector.shape_cast %36 : vector<1x16x16x4xf32> to vector<16x16x4xf32>
    %38 = vector.shape_cast %37 : vector<16x16x4xf32> to vector<256x4xf32>
    %c5 = arith.constant 5 : index
    %c0_39 = arith.constant 0 : index
    %c0_40 = arith.constant 0 : index
    %39 = vector.load %arg2[%c5, %c0_39, %c0_40] : memref<9x4x128xf32, #tpu.memory_space<vmem>>, vector<1x4x128xf32>
    %40 = vector.shape_cast %39 : vector<1x4x128xf32> to vector<4x128xf32>
    %cst_41 = arith.constant dense<0.000000e+00> : vector<256x128xf32>
    %41 = tpu.matmul %38, %40, %cst_41 {dimension_numbers = #tpu.dot_dimension_numbers<[1], [0], [0], [1], [0, 0, 1, 1], [], []>} : vector<256x4xf32>, vector<4x128xf32>, vector<256x128xf32> -> vector<256x128xf32>
    %42 = arith.addf %35, %41 : vector<256x128xf32>
    %c0_42 = arith.constant 0 : index
    %c2_43 = arith.constant 2 : index
    %c0_44 = arith.constant 0 : index
    %c0_45 = arith.constant 0 : index
    %43 = vector.load %arg1[%c0_42, %c2_43, %c0_44, %c0_45] : memref<1x18x18x4xf32, #tpu.memory_space<vmem>>, vector<1x16x16x4xf32>
    %44 = vector.shape_cast %43 : vector<1x16x16x4xf32> to vector<16x16x4xf32>
    %45 = vector.shape_cast %44 : vector<16x16x4xf32> to vector<256x4xf32>
    %c6 = arith.constant 6 : index
    %c0_46 = arith.constant 0 : index
    %c0_47 = arith.constant 0 : index
    %46 = vector.load %arg2[%c6, %c0_46, %c0_47] : memref<9x4x128xf32, #tpu.memory_space<vmem>>, vector<1x4x128xf32>
    %47 = vector.shape_cast %46 : vector<1x4x128xf32> to vector<4x128xf32>
    %cst_48 = arith.constant dense<0.000000e+00> : vector<256x128xf32>
    %48 = tpu.matmul %45, %47, %cst_48 {dimension_numbers = #tpu.dot_dimension_numbers<[1], [0], [0], [1], [0, 0, 1, 1], [], []>} : vector<256x4xf32>, vector<4x128xf32>, vector<256x128xf32> -> vector<256x128xf32>
    %49 = arith.addf %42, %48 : vector<256x128xf32>
    %c0_49 = arith.constant 0 : index
    %c2_50 = arith.constant 2 : index
    %c1_51 = arith.constant 1 : index
    %c0_52 = arith.constant 0 : index
    %50 = vector.load %arg1[%c0_49, %c2_50, %c1_51, %c0_52] : memref<1x18x18x4xf32, #tpu.memory_space<vmem>>, vector<1x16x16x4xf32>
    %51 = vector.shape_cast %50 : vector<1x16x16x4xf32> to vector<16x16x4xf32>
    %52 = vector.shape_cast %51 : vector<16x16x4xf32> to vector<256x4xf32>
    %c7 = arith.constant 7 : index
    %c0_53 = arith.constant 0 : index
    %c0_54 = arith.constant 0 : index
    %53 = vector.load %arg2[%c7, %c0_53, %c0_54] : memref<9x4x128xf32, #tpu.memory_space<vmem>>, vector<1x4x128xf32>
    %54 = vector.shape_cast %53 : vector<1x4x128xf32> to vector<4x128xf32>
    %cst_55 = arith.constant dense<0.000000e+00> : vector<256x128xf32>
    %55 = tpu.matmul %52, %54, %cst_55 {dimension_numbers = #tpu.dot_dimension_numbers<[1], [0], [0], [1], [0, 0, 1, 1], [], []>} : vector<256x4xf32>, vector<4x128xf32>, vector<256x128xf32> -> vector<256x128xf32>
    %56 = arith.addf %49, %55 : vector<256x128xf32>
    %c0_56 = arith.constant 0 : index
    %c2_57 = arith.constant 2 : index
    %c2_58 = arith.constant 2 : index
    %c0_59 = arith.constant 0 : index
    %57 = vector.load %arg1[%c0_56, %c2_57, %c2_58, %c0_59] : memref<1x18x18x4xf32, #tpu.memory_space<vmem>>, vector<1x16x16x4xf32>
    %58 = vector.shape_cast %57 : vector<1x16x16x4xf32> to vector<16x16x4xf32>
    %59 = vector.shape_cast %58 : vector<16x16x4xf32> to vector<256x4xf32>
    %c8 = arith.constant 8 : index
    %c0_60 = arith.constant 0 : index
    %c0_61 = arith.constant 0 : index
    %60 = vector.load %arg2[%c8, %c0_60, %c0_61] : memref<9x4x128xf32, #tpu.memory_space<vmem>>, vector<1x4x128xf32>
    %61 = vector.shape_cast %60 : vector<1x4x128xf32> to vector<4x128xf32>
    %cst_62 = arith.constant dense<0.000000e+00> : vector<256x128xf32>
    %62 = tpu.matmul %59, %61, %cst_62 {dimension_numbers = #tpu.dot_dimension_numbers<[1], [0], [0], [1], [0, 0, 1, 1], [], []>} : vector<256x4xf32>, vector<4x128xf32>, vector<256x128xf32> -> vector<256x128xf32>
    %63 = arith.addf %56, %62 : vector<256x128xf32>
    %c0_63 = arith.constant 0 : index
    %c0_64 = arith.constant 0 : index
    %64 = vector.load %arg3[%c0_63, %c0_64] : memref<1x128xf32, #tpu.memory_space<vmem>>, vector<1x128xf32>
    %65 = vector.broadcast %64 : vector<1x128xf32> to vector<256x128xf32>
    %66 = arith.mulf %63, %65 : vector<256x128xf32>
    %c0_65 = arith.constant 0 : index
    %c0_66 = arith.constant 0 : index
    %67 = vector.load %arg4[%c0_65, %c0_66] : memref<1x128xf32, #tpu.memory_space<vmem>>, vector<1x128xf32>
    %68 = vector.broadcast %67 : vector<1x128xf32> to vector<256x128xf32>
    %69 = arith.addf %66, %68 : vector<256x128xf32>
    %cst_67 = arith.constant 1.000000e-01 : f32
    %70 = vector.broadcast %cst_67 : f32 to vector<256x128xf32>
    %71 = arith.mulf %70, %69 : vector<256x128xf32>
    %72 = arith.maximumf %69, %71 : vector<256x128xf32>
    %c0_68 = arith.constant 0 : index
    %c0_69 = arith.constant 0 : index
    %c0_70 = arith.constant 0 : index
    %73 = vector.load %arg5[%c0_68, %c0_69, %c0_70] : memref<1x256x128xf32, #tpu.memory_space<vmem>>, vector<1x256x128xf32>
    %74 = vector.shape_cast %73 : vector<1x256x128xf32> to vector<256x128xf32>
    %75 = vector.shape_cast %72 : vector<256x128xf32> to vector<1x256x128xf32>
    tpu.vector_store %arg5[%c0_68, %c0_69, %c0_70], %75 {strides = array<i32>} : memref<1x256x128xf32, #tpu.memory_space<vmem>>, vector<1x256x128xf32>,
    return
  }
  func.func @transform_0(%arg0: i32) -> (i32, i32, i32, i32) {
    %c0_i32 = arith.constant 0 : i32
    %c0_i32_0 = arith.constant 0 : i32
    %c0_i32_1 = arith.constant 0 : i32
    %c0_i32_2 = arith.constant 0 : i32
    return %arg0, %c0_i32, %c0_i32_0, %c0_i32_1 : i32, i32, i32, i32
  }
  func.func @transform_1(%arg0: i32) -> (i32, i32, i32) {
    %c0_i32 = arith.constant 0 : i32
    %c0_i32_0 = arith.constant 0 : i32
    %c0_i32_1 = arith.constant 0 : i32
    %c0_i32_2 = arith.constant 0 : i32
    return %c0_i32, %c0_i32_0, %c0_i32_1 : i32, i32, i32
  }
  func.func @transform_2(%arg0: i32) -> (i32, i32) {
    %c0_i32 = arith.constant 0 : i32
    %c0_i32_0 = arith.constant 0 : i32
    %c0_i32_1 = arith.constant 0 : i32
    return %c0_i32, %c0_i32_0 : i32, i32
  }
  func.func @transform_3(%arg0: i32) -> (i32, i32) {
    %c0_i32 = arith.constant 0 : i32
    %c0_i32_0 = arith.constant 0 : i32
    %c0_i32_1 = arith.constant 0 : i32
    return %c0_i32, %c0_i32_0 : i32, i32
  }
  func.func @transform_4(%arg0: i32) -> (i32, i32, i32) {
    %c0_i32 = arith.constant 0 : i32
    %c0_i32_0 = arith.constant 0 : i32
    %c0_i32_1 = arith.constant 0 : i32
    return %arg0, %c0_i32, %c0_i32_0 : i32, i32, i32
  }
}

</mosaic_0001>

<bundles_post_ra>
// kernel: tpu_custom_call.1
= control target key start
LH: loop header
LB: loop body
LE: loop exit
PB: predicated region body
PF: predicated region fallthrough
CT: control target
= control target key end

     0   :  { %9 = vsyncpa [#allocation3], 0  ;;  %s6709_s0 = inlined_call_operand.vmem [shape: f32[2,18,18,4], index: 0, kind: input, shape index: {}]   ;;  %s6710_s1 = inlined_call_operand.vmem [shape: f32[9,4,128], index: 1, kind: input, shape index: {}]   ;;  %s6711_s2 = inlined_call_operand.vmem [shape: f32[1,128], index: 2, kind: input, shape index: {}]   ;;  %s6712_s3 = inlined_call_operand.vmem [shape: f32[1,128], index: 3, kind: input, shape index: {}]   ;;  %s6713_s4 = inlined_call_operand.hbm [shape: f32[2,256,128], index: 4, kind: output, shape index: {}]  }
   0x1   :  { %11 = vsyncpa [#allocation3 + $0x1], 0  ;;  %s5545_s15 = smov 0   ;;  %s5547_s16 = smov 0  }
   0x2   :  { %s5549_s17 = smov 0   ;;  %s5551_s18 = smov 0  }
   0x3 LB: > { %s5566_s19 = sadd.s32 4294967295, %s5515_s18   ;;  %s3895_s20 = sadd.s32 4294967294, %s5515_s18   ;;  %s5515_s18 = sphi %s5551_s18, %s6828_s18   ;;  %s5511_s17 = sphi %s5549_s17, %s6827_s17   ;;  %s5507_s16 = sphi %s5547_s16, %s6826_s16   ;;  %s5503_s15 = sphi %s5545_s15, %s6825_s15  }
   0x4   : > { %s5570_s21 = sadd.s32 1, %s5515_s18   ;;  %s113_s22 = sadd.s32 1, %s5511_s17 }
   0x5   : > { %s110_s23 = ssub.s32 %s5515_s18, %s5570_s21  ;;  %p123_p0 = scmp.ne.s32.totalorder %s5511_s17, %s5507_s16 }
   0x6   : > { %p111_p1 = scmp.eq.s32.totalorder %s110_s23, 0  ;;  %p124_p2 = scmp.eq.s32.totalorder %s5566_s19, 1 }
   0x7   : > { %p129_p3 = scmp.ne.s32.totalorder %s5507_s16, %s5503_s15  ;;  %p130_p4 = scmp.eq.s32.totalorder %s3895_s20, 1 }
   0x8   : > { %s5581_s24 = scalar_select %p111_p1, %s5511_s17, %s113_s22  }
   0x9   : > { %p5583_p5 = por %p124_p2, %p123_p0  ;;  %p5587_p6 = por %p130_p4, %p129_p3 }
   0xa   : > { %p3898_p7 = scmp.ge.s32.totalorder %s5515_s18, 1  ;;  %p165_p8 = scmp.lt.s32.totalorder %s5515_s18, 3 }
   0xc   : > { %p166_p9 = pnand %p3898_p7, %p165_p8 }
   0xe   : > { %169 = sbr.rel (%p166_p9) target bundleno = 552 (0x228), region = 36 }
  0x15   : > { %v3901_v0 = vld [vmem:[%s6710_s1 + $0x4] sm:$0xf]  ;;  %vm360_vm0 = vcmask 1043456   ;;  %v5599_v1 = vld [vmem:[%s6710_s1 + $0x10] sm:$0xf]  ;;  %p191_p10 = scmp.lt.s32.totalorder %s5566_s19, 1 }
  0x16   : > { %4703 = vmatprep.subr.msk.mxu1 %vm360_vm0, %v3901_v0  ;;  %4903 = vmatprep.subr.msk.mxu0 %vm360_vm0, %v5599_v1  ;;  %v228_v2 = vld [vmem:[%s6710_s1] sm:$0xf]  ;;  %v4166_v3 = vld [vmem:[%s6710_s1 + $0x14] sm:$0xf]  ;;  %vm263_vm1 = vcmask 31744   ;;  %s4405_s14 = sshll.u32 %s5566_s19, 12 }
  0x17   : > { %4704 = vmatpush3.msk.msra.mxu1 %vm360_vm0, %v3901_v0  ;;  %4904 = vmatpush3.msk.msra.mxu0 %vm360_vm0, %v5599_v1  ;;  %s192_s9 = scalar_select %p191_p10, %s5566_s19, 1  ;;  %v4232_v9 = vld [vmem:[%s6710_s1 + $0x18] sm:$0xf]  ;;  %v5639_v10 = vld [vmem:[%s6710_s1 + $0x8] sm:$0xf] }
  0x18   : > { %4753 = vmatprep.subr.msk.mxu1 %vm360_vm0, %v228_v2  ;;  %4953 = vmatprep.subr.msk.mxu0 %vm360_vm0, %v4166_v3  ;;  %v5758_v28 = vld [vmem:[%s6710_s1 + $0x1c] sm:$0xf]  ;;  %v5921_v61 = vld [vmem:[%s6710_s1 + $0xc] sm:$0xf]  ;;  %s6660_s27 = scalar_lea.hbm %s6713_s4, %s4405_s14  ;;  %s5517_s29 = smov [#allocation2]  }
  0x19   : > { %s5411_s10 = smul.u32 432, %s192_s9  ;;  %s188_s9 = sand.u32 1, %s5507_s16  }
  0x1a   : > { %s3899_s12 = sshll.u32 %s188_s9, 8  ;;  %s6668_s19 = scalar_lea.sflag [#allocation3], %s188_s9 }
  0x1b   : > { %s5620_s13 = scalar_lea.vmem %s6709_s0, %s5411_s10  ;;  %s5457_s30 = sshll.u32 %s5517_s29, 4  ;;  %s5458_s30 = int_to_ptr.vmem [resolvable:$false] %s5457_s30 }
  0x1c   : > { %v229_v4 = vld [vmem:[%s5620_s13 + $0x1] sm:$0xff]  ;;  %v4068_v5 = vld [vmem:[%s5620_s13 + $0x19] sm:$0xff]  ;;  %v230_v6 = vld [vmem:[%s5620_s13 + $0x9] sm:$0xff]  ;;  %s5459_s5 = scalar_lea.vmem %s5458_s30, 8192 }
  0x1d   : > { %4705 = vmatprep.mubr.msk.f32.mxu1 %vm263_vm1, %v229_v4  ;;  %4905 = vmatprep.mubr.msk.f32.mxu0 %vm263_vm1, %v4068_v5  ;;  %v4069_v7 = vld [vmem:[%s5620_s13 + $0x21] sm:$0xff]  ;;  %v5629_v8 = vld [vmem:[%s5620_s13 + $0x31] sm:$0xff]  ;;  %v5644_v11 = vld [vmem:[%s5620_s13 + $0x39] sm:$0xff] }
  0x1e   : > { %4706 = vmatmul.mubr.msk.f32.vlgmr.msra.gmra.mrb[0].mxu1 %vm263_vm1, %v230_v6  ;;  %4906 = vmatmul.mubr.msk.f32.vlgmr.msra.gmra.mrb[0].mxu0 %vm263_vm1, %v4069_v7  ;;  %v5650_v12 = vld [vmem:[%s5620_s13 + $0x49] sm:$0xff]  ;;  %v5663_v13 = vld [vmem:[%s5620_s13 + $0x51] sm:$0xff]  ;;  %v5666_v14 = vld [vmem:[%s5620_s13 + $0x61] sm:$0xff] }
  0x1f   : > { %4754 = vmatpush3.msk.msra.mxu1 %vm360_vm0, %v228_v2  ;;  %4954 = vmatpush3.msk.msra.mxu0 %vm360_vm0, %v4166_v3  ;;  %v5677_v15 = vld [vmem:[%s5620_s13 + $0x69] sm:$0xff]  ;;  %v5680_v16 = vld [vmem:[%s5620_s13 + $0x79] sm:$0xff]  ;;  %v5691_v17 = vld [vmem:[%s5620_s13 + $0x81] sm:$0xff] }
  0x20   : > { %4708 = vmatprep.mubr.msk.f32.mxu1 %vm263_vm1, %v4068_v5  ;;  %4908 = vmatprep.mubr.msk.f32.mxu0 %vm263_vm1, %v5629_v8  ;;  %v5694_v18 = vld [vmem:[%s5620_s13 + $0x91] sm:$0xff]  ;;  %v5705_v19 = vld [vmem:[%s5620_s13 + $0x99] sm:$0xff]  ;;  %v5708_v20 = vld [vmem:[%s5620_s13 + $0xa9] sm:$0xff] }
  0x21   : > { %5003 = vmatprep.subr.msk.mxu0 %vm360_vm0, %v4232_v9  ;;  %4803 = vmatprep.subr.msk.mxu1 %vm360_vm0, %v5639_v10  ;;  %v5719_v21 = vld [vmem:[%s5620_s13 + $0xb1] sm:$0xff]  ;;  %v5722_v22 = vld [vmem:[%s5620_s13 + $0xc1] sm:$0xff]  ;;  %v5733_v23 = vld [vmem:[%s5620_s13 + $0xc9] sm:$0xff] }
  0x22   : > { %4709 = vmatmul.mubr.msk.f32.gmra.mrb[2].mxu1 %vm263_vm1, %v4069_v7  ;;  %4909 = vmatmul.mubr.msk.f32.gmra.mrb[2].mxu0 %vm263_vm1, %v5644_v11  ;;  %v5736_v24 = vld [vmem:[%s5620_s13 + $0x1a] sm:$0xff]  ;;  %v5747_v25 = vld [vmem:[%s5620_s13 + $0x22] sm:$0xff]  ;;  %v5753_v27 = vld [vmem:[%s5620_s13 + $0x32] sm:$0xff] }
  0x23   : > { %4711 = vmatprep.mubr.msk.f32.mxu1 %vm263_vm1, %v5629_v8  ;;  %4911 = vmatprep.mubr.msk.f32.mxu0 %vm263_vm1, %v5650_v12  ;;  %v5750_v26 = vld [vmem:[%s5620_s13 + $0xd9] sm:$0xff]  ;;  %v5768_v29 = vld [vmem:[%s5620_s13 + $0xe1] sm:$0xff]  ;;  %v5776_v31 = vld [vmem:[%s5620_s13 + $0xf1] sm:$0xff] }
  0x24   : > { %6761 = vst [vmem:[#allocation5_spill] sm:$0xff] %v5768_v29  ;;  %v5771_v30 = vld [vmem:[%s5620_s13 + $0x3a] sm:$0xff]  ;;  %6762 = vst [vmem:[#allocation6_spill] sm:$0xff] %v5776_v31  ;;  %v5779_v32 = vld [vmem:[%s5620_s13 + $0x4a] sm:$0xff] }
  0x25   : > { %v5792_v33 = vld [vmem:[%s5620_s13 + $0xf9] sm:$0xff]  ;;  %v5798_v35 = vld [vmem:[%s5620_s13 + $0x109] sm:$0xff]  ;;  %v5812_v37 = vld [vmem:[%s5620_s13 + $0x111] sm:$0xff] }
  0x26   : > { %4712 = vmatmul.mubr.msk.f32.gmra.mrb[4].mxu1 %vm263_vm1, %v5644_v11  ;;  %4912 = vmatmul.mubr.msk.f32.gmra.mrb[4].mxu0 %vm263_vm1, %v5663_v13  ;;  %6763 = vst [vmem:[#allocation7_spill] sm:$0xff] %v5792_v33  ;;  %v5795_v34 = vld [vmem:[%s5620_s13 + $0x52] sm:$0xff]  ;;  %6764 = vst [vmem:[#allocation8_spill] sm:$0xff] %v5798_v35  ;;  %v5801_v36 = vld [vmem:[%s5620_s13 + $0x62] sm:$0xff] }
  0x27   : > { %4714 = vmatprep.mubr.msk.f32.mxu1 %vm263_vm1, %v5650_v12  ;;  %4914 = vmatprep.mubr.msk.f32.mxu0 %vm263_vm1, %v5666_v14  ;;  %6765 = vst [vmem:[#allocation9_spill] sm:$0xff] %v5812_v37  ;;  %v5815_v38 = vld [vmem:[%s5620_s13 + $0x6a] sm:$0xff]  ;;  %v5818_v39 = vld [vmem:[%s5620_s13 + $0x121] sm:$0xff]  ;;  %v5838_v43 = vld [vmem:[%s5620_s13 + $0x139] sm:$0xff] }
  0x28   : > { %6766 = vst [vmem:[#allocation10_spill] sm:$0xff] %v5818_v39  ;;  %v5821_v40 = vld [vmem:[%s5620_s13 + $0x7a] sm:$0xff]  ;;  %v5832_v41 = vld [vmem:[%s5620_s13 + $0x129] sm:$0xff]  ;;  %6768 = vst [vmem:[#allocation12_spill] sm:$0xff] %v5838_v43 }
  0x29   : > { %6767 = vst [vmem:[#allocation11_spill] sm:$0xff] %v5832_v41  ;;  %v5835_v42 = vld [vmem:[%s5620_s13 + $0x82] sm:$0xff]  ;;  %v5841_v44 = vld [vmem:[%s5620_s13 + $0x92] sm:$0xff]  ;;  %v5855_v46 = vld [vmem:[%s5620_s13 + $0x9a] sm:$0xff] }
  0x2a   : > { %4715 = vmatmul.mubr.msk.f32.gmra.mrb[6].mxu1 %vm263_vm1, %v5663_v13  ;;  %4915 = vmatmul.mubr.msk.f32.gmra.mrb[6].mxu0 %vm263_vm1, %v5677_v15  ;;  %v5852_v45 = vld [vmem:[%s5620_s13 + $0x141] sm:$0xff]  ;;  %v5858_v47 = vld [vmem:[%s5620_s13 + $0x151] sm:$0xff]  ;;  %v5872_v49 = vld [vmem:[%s5620_s13 + $0x159] sm:$0xff] }
  0x2b   : > { %4717 = vmatprep.mubr.msk.f32.mxu1 %vm263_vm1, %v5666_v14  ;;  %4917 = vmatprep.mubr.msk.f32.mxu0 %vm263_vm1, %v5680_v16  ;;  %6769 = vst [vmem:[#allocation13_spill] sm:$0xff] %v5852_v45  ;;  %6770 = vst [vmem:[#allocation14_spill] sm:$0xff] %v5858_v47  ;;  %v5861_v48 = vld [vmem:[%s5620_s13 + $0xaa] sm:$0xff]  ;;  %v5875_v50 = vld [vmem:[%s5620_s13 + $0xb2] sm:$0xff] }
  0x2c   : > { %6771 = vst [vmem:[#allocation15_spill] sm:$0xff] %v5872_v49  ;;  %v5878_v51 = vld [vmem:[%s5620_s13 + $0x169] sm:$0xff]  ;;  %v5892_v53 = vld [vmem:[%s5620_s13 + $0x171] sm:$0xff]  ;;  %v196_v55 = vld [vmem:[%s5620_s13] sm:$0xff] }
  0x2d   : > { %6772 = vst [vmem:[#allocation16_spill] sm:$0xff] %v5878_v51  ;;  %v5881_v52 = vld [vmem:[%s5620_s13 + $0xc2] sm:$0xff]  ;;  %6773 = vst [vmem:[#allocation17_spill] sm:$0xff] %v5892_v53  ;;  %v5895_v54 = vld [vmem:[%s5620_s13 + $0xca] sm:$0xff] }
  0x2e   : > { %4718 = vmatmul.mubr.msk.f32.gmra.mrb[8].mxu1 %vm263_vm1, %v5677_v15  ;;  %4918 = vmatmul.mubr.msk.f32.gmra.mrb[8].mxu0 %vm263_vm1, %v5691_v17  ;;  %v5899_v56 = vld [vmem:[%s5620_s13 + $0xda] sm:$0xff]  ;;  %v197_v57 = vld [vmem:[%s5620_s13 + $0x8] sm:$0xff]  ;;  %v5916_v60 = vld [vmem:[%s5620_s13 + $0xf2] sm:$0xff] }
  0x2f   : > { %4720 = vmatprep.mubr.msk.f32.mxu1 %vm263_vm1, %v5680_v16  ;;  %4920 = vmatprep.mubr.msk.f32.mxu0 %vm263_vm1, %v5694_v18  ;;  %v5910_v58 = vld [vmem:[%s5620_s13 + $0xe2] sm:$0xff]  ;;  %v5913_v59 = vld [vmem:[%s5620_s13 + $0x18] sm:$0xff]  ;;  %v5939_v0 = vld [vmem:[%s5620_s13 + $0x30] sm:$0xff] }
  0x30   : > { %6774 = vst [vmem:[#allocation18_spill] sm:$0xff] %v5913_v59  ;;  %v5931_v62 = vld [vmem:[%s5620_s13 + $0x20] sm:$0xff]  ;;  %6776 = vst [vmem:[#allocation20_spill] sm:$0xff] %v5939_v0  ;;  %v5942_v2 = vld [vmem:[%s5620_s13 + $0x10a] sm:$0xff] }
  0x31   : > { %6775 = vst [vmem:[#allocation19_spill] sm:$0xff] %v5931_v62  ;;  %v5934_v63 = vld [vmem:[%s5620_s13 + $0xfa] sm:$0xff]  ;;  %v5958_v4 = vld [vmem:[%s5620_s13 + $0x112] sm:$0xff]  ;;  %v5961_v5 = vld [vmem:[%s5620_s13 + $0x48] sm:$0xff] }
  0x32   : > { %4721 = vmatmul.mubr.msk.f32.gmra.mrb[10].mxu1 %vm263_vm1, %v5691_v17  ;;  %4921 = vmatmul.mubr.msk.f32.gmra.mrb[10].mxu0 %vm263_vm1, %v5705_v19  ;;  %v5955_v3 = vld [vmem:[%s5620_s13 + $0x38] sm:$0xff]  ;;  %6778 = vst [vmem:[#allocation22_spill] sm:$0xff] %v5961_v5  ;;  %v5964_v6 = vld [vmem:[%s5620_s13 + $0x122] sm:$0xff]  ;;  %v5975_v7 = vld [vmem:[%s5620_s13 + $0x50] sm:$0xff] }
  0x33   : > { %4723 = vmatprep.mubr.msk.f32.mxu1 %vm263_vm1, %v5694_v18  ;;  %4923 = vmatprep.mubr.msk.f32.mxu0 %vm263_vm1, %v5708_v20  ;;  %6777 = vst [vmem:[#allocation21_spill] sm:$0xff] %v5955_v3  ;;  %6779 = vst [vmem:[#allocation23_spill] sm:$0xff] %v5975_v7 }
  0x36   : > { %4724 = vmatmul.mubr.msk.f32.gmra.mrb[12].mxu1 %vm263_vm1, %v5705_v19  ;;  %4924 = vmatmul.mubr.msk.f32.gmra.mrb[12].mxu0 %vm263_vm1, %v5719_v21 }
  0x37   : > { %4726 = vmatprep.mubr.msk.f32.mxu1 %vm263_vm1, %v5708_v20  ;;  %4926 = vmatprep.mubr.msk.f32.mxu0 %vm263_vm1, %v5722_v22 }
  0x3a   : > { %4727 = vmatmul.mubr.msk.f32.gmra.mrb[14].mxu1 %vm263_vm1, %v5719_v21  ;;  %4927 = vmatmul.mubr.msk.f32.gmra.mrb[14].mxu0 %vm263_vm1, %v5733_v23 }
  0x3b   : > { %4729 = vmatprep.mubr.msk.f32.mxu1 %vm263_vm1, %v5722_v22  ;;  %4955 = vmatprep.mubr.msk.f32.mxu0 %vm263_vm1, %v5736_v24 }
  0x3e   : > { %4730 = vmatmul.mubr.msk.f32.gmra.mrb[16].mxu1 %vm263_vm1, %v5733_v23  ;;  %4956 = vmatmul.mubr.msk.f32.vlgmr.msra.gmra.mrb[0].mxu0 %vm263_vm1, %v5747_v25 }
  0x3f   : > { %5004 = vmatpush3.msk.msra.mxu0 %vm360_vm0, %v4232_v9  ;;  %4732 = vmatprep.mubr.msk.f32.mxu1 %vm263_vm1, %v5750_v26  ;;  %v5978_v9 = vld [vmem:[%s5620_s13 + $0x12a] sm:$0xff] }
  0x40   : > { %4958 = vmatprep.mubr.msk.f32.mxu0 %vm263_vm1, %v5753_v27  ;;  %5053 = vmatprep.subr.msk.mxu0 %vm360_vm0, %v5758_v28 }
  0x42   : > { %4733 = vmatmul.mubr.msk.f32.gmra.mrb[18].mxu1 %vm263_vm1, %v5768_v29  ;;  %4959 = vmatmul.mubr.msk.f32.gmra.mrb[2].mxu0 %vm263_vm1, %v5771_v30  ;;  %v6075_v29 = vld [vmem:[%s5620_s13 + $0xd8] sm:$0xff] }
  0x43   : > { %4735 = vmatprep.mubr.msk.f32.mxu1 %vm263_vm1, %v5776_v31  ;;  %4961 = vmatprep.mubr.msk.f32.mxu0 %vm263_vm1, %v5779_v32  ;;  %v6058_v31 = vld [vmem:[%s5620_s13 + $0x18a] sm:$0xff] }
  0x44   : > { %6790 = vst [vmem:[#allocation34_spill] sm:$0xff] %v6058_v31 }
  0x46   : > { %4736 = vmatmul.mubr.msk.f32.gmra.mrb[20].mxu1 %vm263_vm1, %v5792_v33  ;;  %4962 = vmatmul.mubr.msk.f32.gmra.mrb[4].mxu0 %vm263_vm1, %v5795_v34  ;;  %v6044_v33 = vld [vmem:[%s5620_s13 + $0x182] sm:$0xff] }
  0x47   : > { %4738 = vmatprep.mubr.msk.f32.mxu1 %vm263_vm1, %v5798_v35  ;;  %4964 = vmatprep.mubr.msk.f32.mxu0 %vm263_vm1, %v5801_v36  ;;  %v6041_v35 = vld [vmem:[%s5620_s13 + $0xa8] sm:$0xff]  ;;  %6788 = vst [vmem:[#allocation32_spill] sm:$0xff] %v6044_v33 }
  0x48   : > { %6787 = vst [vmem:[#allocation31_spill] sm:$0xff] %v6041_v35 }
  0x4a   : > { %4739 = vmatmul.mubr.msk.f32.gmra.mrb[22].mxu1 %vm263_vm1, %v5812_v37  ;;  %4965 = vmatmul.mubr.msk.f32.gmra.mrb[6].mxu0 %vm263_vm1, %v5815_v38  ;;  %v6038_v37 = vld [vmem:[%s5620_s13 + $0x172] sm:$0xff] }
  0x4b   : > { %4741 = vmatprep.mubr.msk.f32.mxu1 %vm263_vm1, %v5818_v39  ;;  %4967 = vmatprep.mubr.msk.f32.mxu0 %vm263_vm1, %v5821_v40  ;;  %v6035_v39 = vld [vmem:[%s5620_s13 + $0x98] sm:$0xff]  ;;  %6786 = vst [vmem:[#allocation30_spill] sm:$0xff] %v6038_v37 }
  0x4c   : > { %6785 = vst [vmem:[#allocation29_spill] sm:$0xff] %v6035_v39 }
  0x4e   : > { %4742 = vmatmul.mubr.msk.f32.gmra.mrb[24].mxu1 %vm263_vm1, %v5832_v41  ;;  %4968 = vmatmul.mubr.msk.f32.gmra.mrb[8].mxu0 %vm263_vm1, %v5835_v42  ;;  %v6024_v41 = vld [vmem:[%s5620_s13 + $0x16a] sm:$0xff] }
  0x4f   : > { %4744 = vmatprep.mubr.msk.f32.mxu1 %vm263_vm1, %v5838_v43  ;;  %4970 = vmatprep.mubr.msk.f32.mxu0 %vm263_vm1, %v5841_v44  ;;  %v6021_v43 = vld [vmem:[%s5620_s13 + $0x90] sm:$0xff] }
  0x50   : > { %6784 = vst [vmem:[#allocation28_spill] sm:$0xff] %v6021_v43 }
  0x52   : > { %4745 = vmatmul.mubr.msk.f32.gmra.mrb[26].mxu1 %vm263_vm1, %v5852_v45  ;;  %4971 = vmatmul.mubr.msk.f32.gmra.mrb[10].mxu0 %vm263_vm1, %v5855_v46  ;;  %v6018_v45 = vld [vmem:[%s5620_s13 + $0x15a] sm:$0xff] }
  0x53   : > { %4747 = vmatprep.mubr.msk.f32.mxu1 %vm263_vm1, %v5858_v47  ;;  %4973 = vmatprep.mubr.msk.f32.mxu0 %vm263_vm1, %v5861_v48  ;;  %v6015_v47 = vld [vmem:[%s5620_s13 + $0x80] sm:$0xff] }
  0x54   : > { %6783 = vst [vmem:[#allocation27_spill] sm:$0xff] %v6015_v47 }
  0x56   : > { %4748 = vmatmul.mubr.msk.f32.gmra.mrb[28].mxu1 %vm263_vm1, %v5872_v49  ;;  %4974 = vmatmul.mubr.msk.f32.gmra.mrb[12].mxu0 %vm263_vm1, %v5875_v50  ;;  %v6004_v49 = vld [vmem:[%s5620_s13 + $0x152] sm:$0xff] }
  0x57   : > { %4750 = vmatprep.mubr.msk.f32.mxu1 %vm263_vm1, %v5878_v51  ;;  %4976 = vmatprep.mubr.msk.f32.mxu0 %vm263_vm1, %v5881_v52  ;;  %v6001_v51 = vld [vmem:[%s5620_s13 + $0x78] sm:$0xff] }
  0x58   : > { %6782 = vst [vmem:[#allocation26_spill] sm:$0xff] %v6001_v51 }
  0x5a   : > { %4751 = vmatmul.mubr.msk.f32.gmra.mrb[30].mxu1 %vm263_vm1, %v5892_v53  ;;  %4977 = vmatmul.mubr.msk.f32.gmra.mrb[14].mxu0 %vm263_vm1, %v5895_v54  ;;  %v5998_v53 = vld [vmem:[%s5620_s13 + $0x142] sm:$0xff] }
  0x5b   : > { %4755 = vmatprep.mubr.msk.f32.mxu1 %vm263_vm1, %v196_v55  ;;  %4979 = vmatprep.mubr.msk.f32.mxu0 %vm263_vm1, %v5899_v56  ;;  %v5984_v55 = vld [vmem:[%s5620_s13 + $0x13a] sm:$0xff] }
  0x5e   : > { %4756 = vmatmul.mubr.msk.f32.vlgmr.msra.gmra.mrb[0].mxu1 %vm263_vm1, %v197_v57  ;;  %4980 = vmatmul.mubr.msk.f32.gmra.mrb[16].mxu0 %vm263_vm1, %v5910_v58  ;;  %v5995_v57 = vld [vmem:[%s5620_s13 + $0x68] sm:$0xff] }
  0x5f   : > { %4804 = vmatpush3.msk.msra.mxu1 %vm360_vm0, %v5639_v10  ;;  %4758 = vmatprep.mubr.msk.f32.mxu1 %vm263_vm1, %v5913_v59  ;;  %v5981_v10 = vld [vmem:[%s5620_s13 + $0x60] sm:$0xff]  ;;  %6781 = vst [vmem:[#allocation25_spill] sm:$0xff] %v5995_v57 }
  0x60   : > { %4982 = vmatprep.mubr.msk.f32.mxu0 %vm263_vm1, %v5916_v60  ;;  %4853 = vmatprep.subr.msk.mxu1 %vm360_vm0, %v5921_v61  ;;  %6780 = vst [vmem:[#allocation24_spill] sm:$0xff] %v5981_v10  ;;  %v6061_v59 = vld [vmem:[%s5620_s13 + $0xc0] sm:$0xff] }
  0x62   : > { %4759 = vmatmul.mubr.msk.f32.gmra.mrb[2].mxu1 %vm263_vm1, %v5931_v62  ;;  %4983 = vmatmul.mubr.msk.f32.gmra.mrb[18].mxu0 %vm263_vm1, %v5934_v63  ;;  %v6055_v62 = vld [vmem:[%s5620_s13 + $0xb0] sm:$0xff] }
  0x63   : > { %4761 = vmatprep.mubr.msk.f32.mxu1 %vm263_vm1, %v5939_v0  ;;  %4985 = vmatprep.mubr.msk.f32.mxu0 %vm263_vm1, %v5942_v2  ;;  %6789 = vst [vmem:[#allocation33_spill] sm:$0xff] %v6055_v62 }
  0x66   : > { %4762 = vmatmul.mubr.msk.f32.gmra.mrb[4].mxu1 %vm263_vm1, %v5955_v3  ;;  %4986 = vmatmul.mubr.msk.f32.gmra.mrb[20].mxu0 %vm263_vm1, %v5958_v4 }
  0x67   : > { %4764 = vmatprep.mubr.msk.f32.mxu1 %vm263_vm1, %v5961_v5  ;;  %4988 = vmatprep.mubr.msk.f32.mxu0 %vm263_vm1, %v5964_v6 }
  0x6a   : > { %4765 = vmatmul.mubr.msk.f32.gmra.mrb[6].mxu1 %vm263_vm1, %v5975_v7  ;;  %4989 = vmatmul.mubr.msk.f32.gmra.mrb[22].mxu0 %vm263_vm1, %v5978_v9 }
  0x6b   : > { %4767 = vmatprep.mubr.msk.f32.mxu1 %vm263_vm1, %v5981_v10  ;;  %4991 = vmatprep.mubr.msk.f32.mxu0 %vm263_vm1, %v5984_v55 }
  0x6e   : > { %4768 = vmatmul.mubr.msk.f32.gmra.mrb[8].mxu1 %vm263_vm1, %v5995_v57  ;;  %4992 = vmatmul.mubr.msk.f32.gmra.mrb[24].mxu0 %vm263_vm1, %v5998_v53 }
  0x6f   : > { %4770 = vmatprep.mubr.msk.f32.mxu1 %vm263_vm1, %v6001_v51  ;;  %4994 = vmatprep.mubr.msk.f32.mxu0 %vm263_vm1, %v6004_v49 }
  0x72   : > { %4771 = vmatmul.mubr.msk.f32.gmra.mrb[10].mxu1 %vm263_vm1, %v6015_v47  ;;  %4995 = vmatmul.mubr.msk.f32.gmra.mrb[26].mxu0 %vm263_vm1, %v6018_v45 }
  0x73   : > { %4773 = vmatprep.mubr.msk.f32.mxu1 %vm263_vm1, %v6021_v43  ;;  %4997 = vmatprep.mubr.msk.f32.mxu0 %vm263_vm1, %v6024_v41 }
  0x76   : > { %4774 = vmatmul.mubr.msk.f32.gmra.mrb[12].mxu1 %vm263_vm1, %v6035_v39  ;;  %4998 = vmatmul.mubr.msk.f32.gmra.mrb[28].mxu0 %vm263_vm1, %v6038_v37  ;;  %v6080_v37 = vld [vmem:[%s6710_s1 + $0x20] sm:$0xf] }
  0x77   : > { %4776 = vmatprep.mubr.msk.f32.mxu1 %vm263_vm1, %v6041_v35  ;;  %5000 = vmatprep.mubr.msk.f32.mxu0 %vm263_vm1, %v6044_v33  ;;  %v6072_v33 = vld [vmem:[%s5620_s13 + $0xc8] sm:$0xff] }
  0x78   : > { %6791 = vst [vmem:[#allocation35_spill] sm:$0xff] %v6072_v33 }
  0x7a   : > { %4777 = vmatmul.mubr.msk.f32.gmra.mrb[14].mxu1 %vm263_vm1, %v6055_v62  ;;  %5001 = vmatmul.mubr.msk.f32.gmra.mrb[30].mxu0 %vm263_vm1, %v6058_v31  ;;  %v6091_v31 = vld [vmem:[%s5620_s13 + $0xe0] sm:$0xff] }
  0x7b   : > { %4779 = vmatprep.mubr.msk.f32.mxu1 %vm263_vm1, %v6061_v59  ;;  %5005 = vmatprep.mubr.msk.f32.mxu0 %vm263_vm1, %v5939_v0  ;;  %v6096_v0 = vld [vmem:[%s5620_s13 + $0xf0] sm:$0xff] }
  0x7e   : > { %4780 = vmatmul.mubr.msk.f32.gmra.mrb[16].mxu1 %vm263_vm1, %v6072_v33  ;;  %5006 = vmatmul.mubr.msk.f32.vlgmr.msra.gmra.mrb[0].mxu0 %vm263_vm1, %v5955_v3  ;;  %v913_v3 = vld [vmem:[%s5620_s13 + $0x2] sm:$0xff] }
  0x7f   : > { %5054 = vmatpush3.msk.msra.mxu0 %vm360_vm0, %v5758_v28  ;;  %4782 = vmatprep.mubr.msk.f32.mxu1 %vm263_vm1, %v6075_v29  ;;  %v6109_v28 = vld [vmem:[%s5620_s13 + $0xf8] sm:$0xff] }
  0x80   : > { %5008 = vmatprep.mubr.msk.f32.mxu0 %vm263_vm1, %v5961_v5  ;;  %5103 = vmatprep.subr.msk.mxu0 %vm360_vm0, %v6080_v37  ;;  %v6112_v5 = vld [vmem:[%s5620_s13 + $0x108] sm:$0xff] }
  0x82   : > { %4783 = vmatmul.mubr.msk.f32.gmra.mrb[18].mxu1 %vm263_vm1, %v6091_v31  ;;  %5009 = vmatmul.mubr.msk.f32.gmra.mrb[2].mxu0 %vm263_vm1, %v5975_v7  ;;  %v6123_v7 = vld [vmem:[%s5620_s13 + $0x110] sm:$0xff] }
  0x83   : > { %4785 = vmatprep.mubr.msk.f32.mxu1 %vm263_vm1, %v6096_v0  ;;  %5011 = vmatprep.mubr.msk.f32.mxu0 %vm263_vm1, %v5981_v10  ;;  %v6126_v10 = vld [vmem:[%s5620_s13 + $0x120] sm:$0xff] }
  0x86   : > { %4786 = vmatmul.mubr.msk.f32.gmra.mrb[20].mxu1 %vm263_vm1, %v6109_v28  ;;  %5012 = vmatmul.mubr.msk.f32.gmra.mrb[4].mxu0 %vm263_vm1, %v5995_v57  ;;  %v6137_v57 = vld [vmem:[%s5620_s13 + $0x128] sm:$0xff] }
  0x87   : > { %4788 = vmatprep.mubr.msk.f32.mxu1 %vm263_vm1, %v6112_v5  ;;  %5014 = vmatprep.mubr.msk.f32.mxu0 %vm263_vm1, %v6001_v51  ;;  %v6140_v51 = vld [vmem:[%s5620_s13 + $0x138] sm:$0xff] }
  0x8a   : > { %4789 = vmatmul.mubr.msk.f32.gmra.mrb[22].mxu1 %vm263_vm1, %v6123_v7  ;;  %5015 = vmatmul.mubr.msk.f32.gmra.mrb[6].mxu0 %vm263_vm1, %v6015_v47  ;;  %v6151_v47 = vld [vmem:[%s5620_s13 + $0x140] sm:$0xff] }
  0x8b   : > { %4791 = vmatprep.mubr.msk.f32.mxu1 %vm263_vm1, %v6126_v10  ;;  %5017 = vmatprep.mubr.msk.f32.mxu0 %vm263_vm1, %v6021_v43  ;;  %v6154_v43 = vld [vmem:[%s5620_s13 + $0x150] sm:$0xff] }
  0x8e   : > { %4792 = vmatmul.mubr.msk.f32.gmra.mrb[24].mxu1 %vm263_vm1, %v6137_v57  ;;  %5018 = vmatmul.mubr.msk.f32.gmra.mrb[8].mxu0 %vm263_vm1, %v6035_v39  ;;  %v6165_v39 = vld [vmem:[%s5620_s13 + $0x158] sm:$0xff] }
  0x8f   : > { %4794 = vmatprep.mubr.msk.f32.mxu1 %vm263_vm1, %v6140_v51  ;;  %5020 = vmatprep.mubr.msk.f32.mxu0 %vm263_vm1, %v6041_v35  ;;  %v6168_v35 = vld [vmem:[%s5620_s13 + $0x168] sm:$0xff] }
  0x92   : > { %4795 = vmatmul.mubr.msk.f32.gmra.mrb[26].mxu1 %vm263_vm1, %v6151_v47  ;;  %5021 = vmatmul.mubr.msk.f32.gmra.mrb[10].mxu0 %vm263_vm1, %v6055_v62  ;;  %v6179_v62 = vld [vmem:[%s5620_s13 + $0x170] sm:$0xff] }
  0x93   : > { %4797 = vmatprep.mubr.msk.f32.mxu1 %vm263_vm1, %v6154_v43  ;;  %5023 = vmatprep.mubr.msk.f32.mxu0 %vm263_vm1, %v6061_v59 }
  0x96   : > { %4798 = vmatmul.mubr.msk.f32.gmra.mrb[28].mxu1 %vm263_vm1, %v6165_v39  ;;  %5024 = vmatmul.mubr.msk.f32.gmra.mrb[12].mxu0 %vm263_vm1, %v6072_v33  ;;  %v914_v33 = vld [vmem:[%s5620_s13 + $0xa] sm:$0xff] }
  0x97   : > { %4800 = vmatprep.mubr.msk.f32.mxu1 %vm263_vm1, %v6168_v35  ;;  %5026 = vmatprep.mubr.msk.f32.mxu0 %vm263_vm1, %v6075_v29 }
  0x9a   : > { %4801 = vmatmul.mubr.msk.f32.gmra.mrb[30].mxu1 %vm263_vm1, %v6179_v62  ;;  %5027 = vmatmul.mubr.msk.f32.gmra.mrb[14].mxu0 %vm263_vm1, %v6091_v31 }
  0x9b   : > { %4805 = vmatprep.mubr.msk.f32.mxu1 %vm263_vm1, %v913_v3  ;;  %5029 = vmatprep.mubr.msk.f32.mxu0 %vm263_vm1, %v6096_v0  ;;  %v6808_v3 = vld [vmem:[#allocation25_spill] sm:$0xff] }
  0x9e   : > { %4806 = vmatmul.mubr.msk.f32.vlgmr.msra.gmra.mrb[0].mxu1 %vm263_vm1, %v914_v33  ;;  %5030 = vmatmul.mubr.msk.f32.gmra.mrb[16].mxu0 %vm263_vm1, %v6109_v28  ;;  %v4230_v33 = vld [vmem:[%s5620_s13 + $0x198] sm:$0xff] }
  0x9f   : > { %4854 = vmatpush3.msk.msra.mxu1 %vm360_vm0, %v5921_v61  ;;  %4808 = vmatprep.mubr.msk.f32.mxu1 %vm263_vm1, %v5736_v24  ;;  %v6234_v24 = vld [vmem:[%s5620_s13 + $0x180] sm:$0xff] }
  0xa0   : > { %5032 = vmatprep.mubr.msk.f32.mxu0 %vm263_vm1, %v6112_v5  ;;  %5153 = vmatprep.subr.msk.mxu1 %vm360_vm0, %v5599_v1  ;;  %v4231_v61 = vld [vmem:[%s5620_s13 + $0x1a0] sm:$0xff] }
  0xa2   : > { %4809 = vmatmul.mubr.msk.f32.gmra.mrb[2].mxu1 %vm263_vm1, %v5747_v25  ;;  %5033 = vmatmul.mubr.msk.f32.gmra.mrb[18].mxu0 %vm263_vm1, %v6123_v7  ;;  %v6245_v25 = vld [vmem:[%s5620_s13 + $0x188] sm:$0xff] }
  0xa3   : > { %4811 = vmatprep.mubr.msk.f32.mxu1 %vm263_vm1, %v5753_v27  ;;  %5035 = vmatprep.mubr.msk.f32.mxu0 %vm263_vm1, %v6126_v10 }
  0xa6   : > { %4812 = vmatmul.mubr.msk.f32.gmra.mrb[4].mxu1 %vm263_vm1, %v5771_v30  ;;  %5036 = vmatmul.mubr.msk.f32.gmra.mrb[20].mxu0 %vm263_vm1, %v6137_v57 }
  0xa7   : > { %4814 = vmatprep.mubr.msk.f32.mxu1 %vm263_vm1, %v5779_v32  ;;  %5038 = vmatprep.mubr.msk.f32.mxu0 %vm263_vm1, %v6140_v51 }
  0xaa   : > { %4815 = vmatmul.mubr.msk.f32.gmra.mrb[6].mxu1 %vm263_vm1, %v5795_v34  ;;  %5039 = vmatmul.mubr.msk.f32.gmra.mrb[22].mxu0 %vm263_vm1, %v6151_v47 }
  0xab   : > { %4817 = vmatprep.mubr.msk.f32.mxu1 %vm263_vm1, %v5801_v36  ;;  %5041 = vmatprep.mubr.msk.f32.mxu0 %vm263_vm1, %v6154_v43 }
  0xae   : > { %4818 = vmatmul.mubr.msk.f32.gmra.mrb[8].mxu1 %vm263_vm1, %v5815_v38  ;;  %5042 = vmatmul.mubr.msk.f32.gmra.mrb[24].mxu0 %vm263_vm1, %v6165_v39 }
  0xaf   : > { %4820 = vmatprep.mubr.msk.f32.mxu1 %vm263_vm1, %v5821_v40  ;;  %5044 = vmatprep.mubr.msk.f32.mxu0 %vm263_vm1, %v6168_v35 }
  0xb2   : > { %4821 = vmatmul.mubr.msk.f32.gmra.mrb[10].mxu1 %vm263_vm1, %v5835_v42  ;;  %5045 = vmatmul.mubr.msk.f32.gmra.mrb[26].mxu0 %vm263_vm1, %v6179_v62 }
  0xb3   : > { %4823 = vmatprep.mubr.msk.f32.mxu1 %vm263_vm1, %v5841_v44  ;;  %5047 = vmatprep.mubr.msk.f32.mxu0 %vm263_vm1, %v6234_v24 }
  0xb6   : > { %4824 = vmatmul.mubr.msk.f32.gmra.mrb[12].mxu1 %vm263_vm1, %v5855_v46  ;;  %5048 = vmatmul.mubr.msk.f32.gmra.mrb[28].mxu0 %vm263_vm1, %v6245_v25 }
  0xb7   : > { %4826 = vmatprep.mubr.msk.f32.mxu1 %vm263_vm1, %v5861_v48  ;;  %5050 = vmatprep.mubr.msk.f32.mxu0 %vm263_vm1, %v4230_v33  ;;  %v6809_v33 = vld [vmem:[#allocation13_spill] sm:$0xff] }
  0xba   : > { %4827 = vmatmul.mubr.msk.f32.gmra.mrb[14].mxu1 %vm263_vm1, %v5875_v50  ;;  %5051 = vmatmul.mubr.msk.f32.gmra.mrb[30].mxu0 %vm263_vm1, %v4231_v61  ;;  %v6810_v61 = vld [vmem:[#allocation26_spill] sm:$0xff] }
  0xbb   : > { %4829 = vmatprep.mubr.msk.f32.mxu1 %vm263_vm1, %v5881_v52  ;;  %5055 = vmatprep.mubr.msk.f32.mxu0 %vm263_vm1, %v5629_v8  ;;  %v6792_v8 = vld [vmem:[#allocation30_spill] sm:$0xff] }
  0xbe   : > { %4830 = vmatmul.mubr.msk.f32.gmra.mrb[16].mxu1 %vm263_vm1, %v5895_v54  ;;  %5056 = vmatmul.mubr.msk.f32.vlgmr.msra.gmra.mrb[0].mxu0 %vm263_vm1, %v5644_v11  ;;  %v6793_v11 = vld [vmem:[#allocation5_spill] sm:$0xff] }
  0xbf   : > { %5104 = vmatpush3.msk.msra.mxu0 %vm360_vm0, %v6080_v37  ;;  %4832 = vmatprep.mubr.msk.f32.mxu1 %vm263_vm1, %v5899_v56  ;;  %v6807_v37 = vld [vmem:[#allocation12_spill] sm:$0xff] }
  0xc0   : > { %5058 = vmatprep.mubr.msk.f32.mxu0 %vm263_vm1, %v5650_v12  ;;  %v6794_v12 = vld [vmem:[#allocation18_spill] sm:$0xff] }
  0xc2   : > { %4833 = vmatmul.mubr.msk.f32.gmra.mrb[18].mxu1 %vm263_vm1, %v5910_v58  ;;  %5059 = vmatmul.mubr.msk.f32.gmra.mrb[2].mxu0 %vm263_vm1, %v5663_v13  ;;  %v6795_v13 = vld [vmem:[#allocation6_spill] sm:$0xff] }
  0xc3   : > { %4835 = vmatprep.mubr.msk.f32.mxu1 %vm263_vm1, %v5916_v60  ;;  %5061 = vmatprep.mubr.msk.f32.mxu0 %vm263_vm1, %v5666_v14  ;;  %v6796_v14 = vld [vmem:[#allocation19_spill] sm:$0xff] }
  0xc6   : > { %4836 = vmatmul.mubr.msk.f32.gmra.mrb[20].mxu1 %vm263_vm1, %v5934_v63  ;;  %5062 = vmatmul.mubr.msk.f32.gmra.mrb[4].mxu0 %vm263_vm1, %v5677_v15  ;;  %v6797_v15 = vld [vmem:[#allocation7_spill] sm:$0xff] }
  0xc7   : > { %4838 = vmatprep.mubr.msk.f32.mxu1 %vm263_vm1, %v5942_v2  ;;  %5064 = vmatprep.mubr.msk.f32.mxu0 %vm263_vm1, %v5680_v16  ;;  %v6798_v16 = vld [vmem:[#allocation20_spill] sm:$0xff] }
  0xca   : > { %4839 = vmatmul.mubr.msk.f32.gmra.mrb[22].mxu1 %vm263_vm1, %v5958_v4  ;;  %5065 = vmatmul.mubr.msk.f32.gmra.mrb[6].mxu0 %vm263_vm1, %v5691_v17  ;;  %v6799_v17 = vld [vmem:[#allocation8_spill] sm:$0xff] }
  0xcb   : > { %4841 = vmatprep.mubr.msk.f32.mxu1 %vm263_vm1, %v5964_v6  ;;  %5067 = vmatprep.mubr.msk.f32.mxu0 %vm263_vm1, %v5694_v18  ;;  %v6800_v18 = vld [vmem:[#allocation21_spill] sm:$0xff] }
  0xce   : > { %4842 = vmatmul.mubr.msk.f32.gmra.mrb[24].mxu1 %vm263_vm1, %v5978_v9  ;;  %5068 = vmatmul.mubr.msk.f32.gmra.mrb[8].mxu0 %vm263_vm1, %v5705_v19  ;;  %v6801_v19 = vld [vmem:[#allocation9_spill] sm:$0xff] }
  0xcf   : > { %4844 = vmatprep.mubr.msk.f32.mxu1 %vm263_vm1, %v5984_v55  ;;  %5070 = vmatprep.mubr.msk.f32.mxu0 %vm263_vm1, %v5708_v20  ;;  %v6802_v20 = vld [vmem:[#allocation22_spill] sm:$0xff] }
  0xd2   : > { %4845 = vmatmul.mubr.msk.f32.gmra.mrb[26].mxu1 %vm263_vm1, %v5998_v53  ;;  %5071 = vmatmul.mubr.msk.f32.gmra.mrb[10].mxu0 %vm263_vm1, %v5719_v21  ;;  %v6803_v21 = vld [vmem:[#allocation10_spill] sm:$0xff] }
  0xd3   : > { %4847 = vmatprep.mubr.msk.f32.mxu1 %vm263_vm1, %v6004_v49  ;;  %5073 = vmatprep.mubr.msk.f32.mxu0 %vm263_vm1, %v5722_v22  ;;  %v6805_v22 = vld [vmem:[#allocation11_spill] sm:$0xff] }
  0xd6   : > { %4848 = vmatmul.mubr.msk.f32.gmra.mrb[28].mxu1 %vm263_vm1, %v6018_v45  ;;  %5074 = vmatmul.mubr.msk.f32.gmra.mrb[12].mxu0 %vm263_vm1, %v5733_v23  ;;  %v6806_v23 = vld [vmem:[#allocation24_spill] sm:$0xff] }
  0xd7   : > { %4850 = vmatprep.mubr.msk.f32.mxu1 %vm263_vm1, %v6024_v41  ;;  %5076 = vmatprep.mubr.msk.f32.mxu0 %vm263_vm1, %v5750_v26 }
  0xda   : > { %4851 = vmatmul.mubr.msk.f32.gmra.mrb[30].mxu1 %vm263_vm1, %v6792_v8  ;;  %5077 = vmatmul.mubr.msk.f32.gmra.mrb[14].mxu0 %vm263_vm1, %v6793_v11  ;;  %v6819_v8 = vld [vmem:[#allocation33_spill] sm:$0xff] }
  0xdb   : > { %4855 = vmatprep.mubr.msk.f32.mxu1 %vm263_vm1, %v6794_v12  ;;  %5079 = vmatprep.mubr.msk.f32.mxu0 %vm263_vm1, %v6795_v13  ;;  %v6811_v12 = vld [vmem:[#allocation14_spill] sm:$0xff] }
  0xde   : > { %4856 = vmatmul.mubr.msk.f32.vlgmr.msra.gmra.mrb[0].mxu1 %vm263_vm1, %v6796_v14  ;;  %5080 = vmatmul.mubr.msk.f32.gmra.mrb[16].mxu0 %vm263_vm1, %v6797_v15  ;;  %v6812_v14 = vld [vmem:[#allocation27_spill] sm:$0xff] }
  0xdf   : > { %5154 = vmatpush3.msk.msra.mxu1 %vm360_vm0, %v5599_v1  ;;  %4858 = vmatprep.mubr.msk.f32.mxu1 %vm263_vm1, %v6798_v16  ;;  %v6804_v1 = vld [vmem:[#allocation23_spill] sm:$0xff] }
  0xe0   : > { %5082 = vmatprep.mubr.msk.f32.mxu0 %vm263_vm1, %v6799_v17  ;;  %v6813_v16 = vld [vmem:[#allocation15_spill] sm:$0xff] }
  0xe2   : > { %4859 = vmatmul.mubr.msk.f32.gmra.mrb[2].mxu1 %vm263_vm1, %v6800_v18  ;;  %5083 = vmatmul.mubr.msk.f32.gmra.mrb[18].mxu0 %vm263_vm1, %v6801_v19  ;;  %v6814_v18 = vld [vmem:[#allocation28_spill] sm:$0xff] }
  0xe3   : > { %4861 = vmatprep.mubr.msk.f32.mxu1 %vm263_vm1, %v6802_v20  ;;  %5085 = vmatprep.mubr.msk.f32.mxu0 %vm263_vm1, %v6803_v21  ;;  %v6815_v20 = vld [vmem:[#allocation16_spill] sm:$0xff] }
  0xe6   : > { %4862 = vmatmul.mubr.msk.f32.gmra.mrb[4].mxu1 %vm263_vm1, %v6804_v1  ;;  %5086 = vmatmul.mubr.msk.f32.gmra.mrb[20].mxu0 %vm263_vm1, %v6805_v22  ;;  %v6372_v1 = vld [vmem:[%s5620_s13 + $0x181] sm:$0xff] }
  0xe7   : > { %4864 = vmatprep.mubr.msk.f32.mxu1 %vm263_vm1, %v6806_v23  ;;  %5088 = vmatprep.mubr.msk.f32.mxu0 %vm263_vm1, %v6807_v37  ;;  %v6816_v23 = vld [vmem:[#allocation29_spill] sm:$0xff] }
  0xea   : > { %4865 = vmatmul.mubr.msk.f32.gmra.mrb[6].mxu1 %vm263_vm1, %v6808_v3  ;;  %5089 = vmatmul.mubr.msk.f32.gmra.mrb[22].mxu0 %vm263_vm1, %v6809_v33  ;;  %v6817_v3 = vld [vmem:[#allocation17_spill] sm:$0xff] }
  0xeb   : > { %4867 = vmatprep.mubr.msk.f32.mxu1 %vm263_vm1, %v6810_v61  ;;  %5091 = vmatprep.mubr.msk.f32.mxu0 %vm263_vm1, %v6811_v12  ;;  %v6818_v61 = vld [vmem:[#allocation31_spill] sm:$0xff] }
  0xee   : > { %4868 = vmatmul.mubr.msk.f32.gmra.mrb[8].mxu1 %vm263_vm1, %v6812_v14  ;;  %5092 = vmatmul.mubr.msk.f32.gmra.mrb[24].mxu0 %vm263_vm1, %v6813_v16  ;;  %v6383_v14 = vld [vmem:[%s5620_s13 + $0x189] sm:$0xff] }
  0xef   : > { %4870 = vmatprep.mubr.msk.f32.mxu1 %vm263_vm1, %v6814_v18  ;;  %5094 = vmatprep.mubr.msk.f32.mxu0 %vm263_vm1, %v6815_v20  ;;  %v4296_v18 = vld [vmem:[%s5620_s13 + $0x199] sm:$0xff] }
  0xf2   : > { %4871 = vmatmul.mubr.msk.f32.gmra.mrb[10].mxu1 %vm263_vm1, %v6816_v23  ;;  %5095 = vmatmul.mubr.msk.f32.gmra.mrb[26].mxu0 %vm263_vm1, %v6817_v3  ;;  %v4297_v23 = vld [vmem:[%s5620_s13 + $0x1a1] sm:$0xff]  ;;  %v6820_v3 = vld [vmem:[#allocation35_spill] sm:$0xff] }
  0xf3   : > { %4873 = vmatprep.mubr.msk.f32.mxu1 %vm263_vm1, %v6818_v61  ;;  %5097 = vmatprep.mubr.msk.f32.mxu0 %vm263_vm1, %v6372_v1 }
  0xf6   : > { %4874 = vmatmul.mubr.msk.f32.gmra.mrb[12].mxu1 %vm263_vm1, %v6819_v8  ;;  %5098 = vmatmul.mubr.msk.f32.gmra.mrb[28].mxu0 %vm263_vm1, %v6383_v14 }
  0xf7   : > { %4876 = vmatprep.mubr.msk.f32.mxu1 %vm263_vm1, %v6061_v59  ;;  %5100 = vmatprep.mubr.msk.f32.mxu0 %vm263_vm1, %v4296_v18 }
  0xfa   : > { %4877 = vmatmul.mubr.msk.f32.gmra.mrb[14].mxu1 %vm263_vm1, %v6820_v3  ;;  %5101 = vmatmul.mubr.msk.f32.gmra.mrb[30].mxu0 %vm263_vm1, %v4297_v23 }
  0xfb   : > { %4879 = vmatprep.mubr.msk.f32.mxu1 %vm263_vm1, %v6075_v29  ;;  %5105 = vmatprep.mubr.msk.f32.mxu0 %vm263_vm1, %v5753_v27  ;;  %v6822_v27 = vld [vmem:[#allocation32_spill] sm:$0xff] }
  0xfc   : > { %v4362_v29 = vld [vmem:[%s5620_s13 + $0x19a] sm:$0xff] }
  0xfe   : > { %4880 = vmatmul.mubr.msk.f32.gmra.mrb[16].mxu1 %vm263_vm1, %v6091_v31  ;;  %5106 = vmatmul.mubr.msk.f32.vlgmr.msra.gmra.mrb[0].mxu0 %vm263_vm1, %v5771_v30  ;;  %v6823_v30 = vld [vmem:[#allocation17_spill] sm:$0xff]  ;;  %v6824_v31 = vld [vmem:[#allocation34_spill] sm:$0xff] }
  0xff   : > { %4882 = vmatprep.mubr.msk.f32.mxu1 %vm263_vm1, %v6096_v0  ;;  %5108 = vmatprep.mubr.msk.f32.mxu0 %vm263_vm1, %v5779_v32  ;;  %v4363_v32 = vld [vmem:[%s5620_s13 + $0x1a2] sm:$0xff]  ;;  %s6560_s13 = scalar_lea.vmem [#allocation2], %s3899_s12 }
 0x100   : > { %s3833_s20 = sshll.u32 %s6560_s13, 4  ;;  %s6662_s20 = int_to_ptr.vmem [resolvable:$true] %s3833_s20 }
 0x101   : > { %s5453_s28 = scalar_lea.vmem %s6662_s20, 4096  ;;  %p5460_p0 = scmp.lt.s32.totalorder %s6662_s20, %s5458_s30 }
 0x102   : > { %4883 = vmatmul.mubr.msk.f32.gmra.mrb[18].mxu1 %vm263_vm1, %v6109_v28  ;;  %5109 = vmatmul.mubr.msk.f32.gmra.mrb[2].mxu0 %vm263_vm1, %v5795_v34  ;;  %p5454_p11 = scmp.ne.s32.totalorder %s6662_s20, %s5453_s28  ;;  %p5461_p1 = scmp.lt.s32.totalorder %s5459_s5, %s5453_s28 }
 0x103   : > { %4885 = vmatprep.mubr.msk.f32.mxu1 %vm263_vm1, %v6112_v5  ;;  %5111 = vmatprep.mubr.msk.f32.mxu0 %vm263_vm1, %v5801_v36 }
 0x104   : > { %p5455_p12 = pnand %p5454_p11, %p5583_p5  ;;  %p5462_p2 = por %p5461_p1, %p5460_p0 }
 0x106   : > { %4886 = vmatmul.mubr.msk.f32.gmra.mrb[20].mxu1 %vm263_vm1, %v6123_v7  ;;  %5112 = vmatmul.mubr.msk.f32.gmra.mrb[4].mxu0 %vm263_vm1, %v5815_v38  ;;  %p5456_p13 = pneg %p5455_p12 }
 0x107   : > { %4888 = vmatprep.mubr.msk.f32.mxu1 %vm263_vm1, %v6126_v10  ;;  %5114 = vmatprep.mubr.msk.f32.mxu0 %vm263_vm1, %v5821_v40 }
 0x108   : > { %p5463_p3 = pnand %p5462_p2, %p5456_p13 }
 0x10a   : > { %4889 = vmatmul.mubr.msk.f32.gmra.mrb[22].mxu1 %vm263_vm1, %v6137_v57  ;;  %5115 = vmatmul.mubr.msk.f32.gmra.mrb[6].mxu0 %vm263_vm1, %v5835_v42 }
 0x10b   : > { %4891 = vmatprep.mubr.msk.f32.mxu1 %vm263_vm1, %v6140_v51  ;;  %5117 = vmatprep.mubr.msk.f32.mxu0 %vm263_vm1, %v5841_v44 }
 0x10e   : > { %4892 = vmatmul.mubr.msk.f32.gmra.mrb[24].mxu1 %vm263_vm1, %v6151_v47  ;;  %5118 = vmatmul.mubr.msk.f32.gmra.mrb[8].mxu0 %vm263_vm1, %v5855_v46 }
 0x10f   : > { %4894 = vmatprep.mubr.msk.f32.mxu1 %vm263_vm1, %v6154_v43  ;;  %5120 = vmatprep.mubr.msk.f32.mxu0 %vm263_vm1, %v5861_v48 }
 0x112   : > { %4895 = vmatmul.mubr.msk.f32.gmra.mrb[26].mxu1 %vm263_vm1, %v6165_v39  ;;  %5121 = vmatmul.mubr.msk.f32.gmra.mrb[10].mxu0 %vm263_vm1, %v5875_v50 }
 0x113   : > { %4897 = vmatprep.mubr.msk.f32.mxu1 %vm263_vm1, %v6168_v35  ;;  %5123 = vmatprep.mubr.msk.f32.mxu0 %vm263_vm1, %v5881_v52  ;;  %v6542_v52 = vld [vmem:[%s6711_s2] ss:$0 sm:$0xff] }
 0x116   : > { %4898 = vmatmul.mubr.msk.f32.gmra.mrb[28].mxu1 %vm263_vm1, %v6179_v62  ;;  %5124 = vmatmul.mubr.msk.f32.gmra.mrb[12].mxu0 %vm263_vm1, %v5895_v54 }
 0x117   : > { %4900 = vmatprep.mubr.msk.f32.mxu1 %vm263_vm1, %v6234_v24  ;;  %5126 = vmatprep.mubr.msk.f32.mxu0 %vm263_vm1, %v5899_v56  ;;  %v6548_v56 = vld [vmem:[%s6712_s3] ss:$0 sm:$0xff] }
 0x11a   : > { %4901 = vmatmul.mubr.msk.f32.gmra.mrb[30].mxu1 %vm263_vm1, %v6245_v25  ;;  %5127 = vmatmul.mubr.msk.f32.gmra.mrb[14].mxu0 %vm263_vm1, %v5910_v58 }
 0x11b   : > { %4929 = vmatprep.mubr.msk.f32.mxu1 %vm263_vm1, %v5750_v26  ;;  %5129 = vmatprep.mubr.msk.f32.mxu0 %vm263_vm1, %v5916_v60  ;;  %v6821_v26 = vld [vmem:[#allocation30_spill] sm:$0xff] }
 0x11e   : > { %4930 = vmatmul.mubr.msk.f32.vlgmr.msra.gmra.mrb[16].mxu1 %vm263_vm1, %v6793_v11  ;;  %5130 = vmatmul.mubr.msk.f32.gmra.mrb[16].mxu0 %vm263_vm1, %v5934_v63 }
 0x11f   : > { %4932 = vmatprep.mubr.msk.f32.mxu1 %vm263_vm1, %v6795_v13  ;;  %5132 = vmatprep.mubr.msk.f32.mxu0 %vm263_vm1, %v5942_v2 }
 0x122   : > { %4933 = vmatmul.mubr.msk.f32.gmra.mrb[18].mxu1 %vm263_vm1, %v6797_v15  ;;  %5133 = vmatmul.mubr.msk.f32.gmra.mrb[18].mxu0 %vm263_vm1, %v5958_v4 }
 0x123   : > { %4935 = vmatprep.mubr.msk.f32.mxu1 %vm263_vm1, %v6799_v17  ;;  %5135 = vmatprep.mubr.msk.f32.mxu0 %vm263_vm1, %v5964_v6 }
 0x126   : > { %4936 = vmatmul.mubr.msk.f32.gmra.mrb[20].mxu1 %vm263_vm1, %v6801_v19  ;;  %5136 = vmatmul.mubr.msk.f32.gmra.mrb[20].mxu0 %vm263_vm1, %v5978_v9 }
 0x127   : > { %4938 = vmatprep.mubr.msk.f32.mxu1 %vm263_vm1, %v6803_v21  ;;  %5138 = vmatprep.mubr.msk.f32.mxu0 %vm263_vm1, %v5984_v55 }
 0x12a   : > { %4939 = vmatmul.mubr.msk.f32.gmra.mrb[22].mxu1 %vm263_vm1, %v6805_v22  ;;  %5139 = vmatmul.mubr.msk.f32.gmra.mrb[22].mxu0 %vm263_vm1, %v5998_v53 }
 0x12b   : > { %4941 = vmatprep.mubr.msk.f32.mxu1 %vm263_vm1, %v6807_v37  ;;  %5141 = vmatprep.mubr.msk.f32.mxu0 %vm263_vm1, %v6004_v49 }
 0x12e   : > { %4942 = vmatmul.mubr.msk.f32.gmra.mrb[24].mxu1 %vm263_vm1, %v6809_v33  ;;  %5142 = vmatmul.mubr.msk.f32.gmra.mrb[24].mxu0 %vm263_vm1, %v6018_v45 }
 0x12f   : > { %4944 = vmatprep.mubr.msk.f32.mxu1 %vm263_vm1, %v6811_v12  ;;  %5144 = vmatprep.mubr.msk.f32.mxu0 %vm263_vm1, %v6024_v41 }
 0x132   : > { %4945 = vmatmul.mubr.msk.f32.gmra.mrb[26].mxu1 %vm263_vm1, %v6813_v16  ;;  %5145 = vmatmul.mubr.msk.f32.gmra.mrb[26].mxu0 %vm263_vm1, %v6821_v26 }
 0x133   : > { %4947 = vmatprep.mubr.msk.f32.mxu1 %vm263_vm1, %v6815_v20  ;;  %5147 = vmatprep.mubr.msk.f32.mxu0 %vm263_vm1, %v6822_v27 }
 0x136   : > { %4948 = vmatmul.mubr.msk.f32.gmra.mrb[28].mxu1 %vm263_vm1, %v6823_v30  ;;  %5148 = vmatmul.mubr.msk.f32.gmra.mrb[28].mxu0 %vm263_vm1, %v6824_v31 }
 0x137   : > { %4950 = vmatprep.mubr.msk.f32.mxu1 %vm263_vm1, %v6372_v1  ;;  %5150 = vmatprep.mubr.msk.f32.mxu0 %vm263_vm1, %v4362_v29 }
 0x13a   : > { %4951 = vmatmul.mubr.msk.f32.gmra.mrb[30].mxu1 %vm263_vm1, %v6383_v14  ;;  %5151 = vmatmul.mubr.msk.f32.gmra.mrb[30].mxu0 %vm263_vm1, %v4363_v32 }
 0x1b1   : > { %v4857_v34 = vpop.f32.mrb[0].mxu1 }
 0x1b2   : > { %v1503_v35 = vpop.f32.mrb[1].mxu1 }
 0x1b5   : > { %v4860_v36 = vpop.f32.mrb[2].mxu1 }
 0x1b6   : > { %v1513_v38 = vpop.f32.mrb[3].mxu1 }
 0x1b9   : > { %v4863_v39 = vpop.f32.mrb[4].mxu1 }
 0x1ba   : > { %v1523_v40 = vpop.f32.mrb[5].mxu1 }
 0x1bd   : > { %v4866_v41 = vpop.f32.mrb[6].mxu1 }
 0x1be   : > { %v1533_v42 = vpop.f32.mrb[7].mxu1 }
 0x1c1   : > { %v4869_v43 = vpop.f32.mrb[8].mxu1 }
 0x1c2   : > { %v6525_v44 = vpop.f32.mrb[9].mxu1 }
 0x1c5   : > { %v6527_v45 = vpop.f32.mrb[10].mxu1 }
 0x1c6   : > { %v6529_v46 = vpop.f32.mrb[11].mxu1 }
 0x1c9   : > { %v6531_v47 = vpop.f32.mrb[12].mxu1 }
 0x1ca   : > { %v6533_v48 = vpop.f32.mrb[13].mxu1 }
 0x1cd   : > { %v6535_v49 = vpop.f32.mrb[14].mxu1 }
 0x1ce   : > { %v6537_v50 = vpop.f32.mrb[15].mxu1 }
 0x1d1   : > { %v5107_v51 = vpop.f32.mrb[0].mxu0 }
 0x1d2   : > { %v5155_v53 = vadd.f32 %v5107_v51, %v4857_v34  ;;  %v3454_v54 = vpop.f32.mrb[1].mxu0 }
 0x1d3   : > { %v5156_v58 = vadd.f32 %v3454_v54, %v1503_v35 }
 0x1d4   : > { %v3653_v59 = vmul.f32 %v5155_v53, %v6542_v52 }
 0x1d5   : > { %v3652_v60 = vmul.f32 %v5156_v58, %v6542_v52  ;;  %v5110_v62 = vpop.f32.mrb[2].mxu0 }
 0x1d6   : > { %v3692_v63 = vadd.f32 %v6548_v56, %v3653_v59  ;;  %v5157_v0 = vadd.f32 %v5110_v62, %v4860_v36  ;;  %v3464_v2 = vpop.f32.mrb[3].mxu0 }
 0x1d7   : > { %v3691_v4 = vadd.f32 %v6548_v56, %v3652_v60  ;;  %v5158_v5 = vadd.f32 %v3464_v2, %v1513_v38 }
 0x1d8   : > { %v3724_v6 = vmul.f32 0.1, %v3692_v63  ;;  %v3655_v7 = vmul.f32 %v5157_v0, %v6542_v52 }
 0x1d9   : > { %v3723_v9 = vmul.f32 0.1, %v3691_v4  ;;  %v3654_v10 = vmul.f32 %v5158_v5, %v6542_v52  ;;  %v5113_v55 = vpop.f32.mrb[4].mxu0 }
 0x1da   : > { %v3756_v57 = vmax.f32 %v3692_v63, %v3724_v6  ;;  %v3694_v28 = vadd.f32 %v6548_v56, %v3655_v7  ;;  %v5159_v24 = vadd.f32 %v5113_v55, %v4863_v39  ;;  %v3474_v25 = vpop.f32.mrb[5].mxu0 }
 0x1db   : > { %v3755_v8 = vmax.f32 %v3691_v4, %v3723_v9  ;;  %v3693_v11 = vadd.f32 %v6548_v56, %v3654_v10  ;;  %v5160_v13 = vadd.f32 %v3474_v25, %v1523_v40 }
 0x1dc   : > { %3788 = vst [vmem:[%s6560_s13 + $0x8] sm:$0xff] %v3756_v57  ;;  %v3726_v15 = vmul.f32 0.1, %v3694_v28  ;;  %v3657_v17 = vmul.f32 %v5159_v24, %v6542_v52 }
 0x1dd   : > { %3787 = vst [vmem:[%s6560_s13] sm:$0xff] %v3755_v8  ;;  %v3725_v19 = vmul.f32 0.1, %v3693_v11  ;;  %v3656_v21 = vmul.f32 %v5160_v13, %v6542_v52  ;;  %v5116_v22 = vpop.f32.mrb[6].mxu0 }
 0x1de   : > { %v3758_v37 = vmax.f32 %v3694_v28, %v3726_v15  ;;  %v3696_v33 = vadd.f32 %v6548_v56, %v3657_v17  ;;  %v5161_v12 = vadd.f32 %v5116_v22, %v4866_v41  ;;  %v3484_v16 = vpop.f32.mrb[7].mxu0 }
 0x1df   : > { %v3757_v20 = vmax.f32 %v3693_v11, %v3725_v19  ;;  %v3695_v1 = vadd.f32 %v6548_v56, %v3656_v21  ;;  %v5162_v3 = vadd.f32 %v3484_v16, %v1533_v42 }
 0x1e0   : > { %3790 = vst [vmem:[%s6560_s13 + $0x18] sm:$0xff] %v3758_v37  ;;  %v3728_v61 = vmul.f32 0.1, %v3696_v33  ;;  %v3659_v14 = vmul.f32 %v5161_v12, %v6542_v52 }
 0x1e1   : > { %3789 = vst [vmem:[%s6560_s13 + $0x10] sm:$0xff] %v3757_v20  ;;  %v3727_v18 = vmul.f32 0.1, %v3695_v1  ;;  %v3658_v23 = vmul.f32 %v5162_v3, %v6542_v52  ;;  %v5119_v26 = vpop.f32.mrb[8].mxu0 }
 0x1e2   : > { %v3760_v27 = vmax.f32 %v3696_v33, %v3728_v61  ;;  %v3698_v29 = vadd.f32 %v6548_v56, %v3659_v14  ;;  %v5163_v30 = vadd.f32 %v5119_v26, %v4869_v43  ;;  %v3494_v31 = vpop.f32.mrb[9].mxu0 }
 0x1e3   : > { %v3759_v32 = vmax.f32 %v3695_v1, %v3727_v18  ;;  %v3697_v34 = vadd.f32 %v6548_v56, %v3658_v23  ;;  %v5164_v35 = vadd.f32 %v3494_v31, %v6525_v44 }
 0x1e4   : > { %3792 = vst [vmem:[%s6560_s13 + $0x28] sm:$0xff] %v3760_v27  ;;  %v3730_v36 = vmul.f32 0.1, %v3698_v29  ;;  %v3661_v38 = vmul.f32 %v5163_v30, %v6542_v52 }
 0x1e5   : > { %3791 = vst [vmem:[%s6560_s13 + $0x20] sm:$0xff] %v3759_v32  ;;  %v3729_v39 = vmul.f32 0.1, %v3697_v34  ;;  %v3660_v40 = vmul.f32 %v5164_v35, %v6542_v52  ;;  %v5122_v41 = vpop.f32.mrb[10].mxu0 }
 0x1e6   : > { %v3762_v42 = vmax.f32 %v3698_v29, %v3730_v36  ;;  %v3700_v43 = vadd.f32 %v6548_v56, %v3661_v38  ;;  %v5165_v51 = vadd.f32 %v5122_v41, %v6527_v45  ;;  %v3504_v53 = vpop.f32.mrb[11].mxu0 }
 0x1e7   : > { %v3761_v54 = vmax.f32 %v3697_v34, %v3729_v39  ;;  %v3699_v58 = vadd.f32 %v6548_v56, %v3660_v40  ;;  %v5166_v44 = vadd.f32 %v3504_v53, %v6529_v46 }
 0x1e8   : > { %3794 = vst [vmem:[%s6560_s13 + $0x38] sm:$0xff] %v3762_v42  ;;  %v3732_v59 = vmul.f32 0.1, %v3700_v43  ;;  %v3663_v60 = vmul.f32 %v5165_v51, %v6542_v52 }
 0x1e9   : > { %3793 = vst [vmem:[%s6560_s13 + $0x30] sm:$0xff] %v3761_v54  ;;  %v3731_v62 = vmul.f32 0.1, %v3699_v58  ;;  %v3662_v63 = vmul.f32 %v5166_v44, %v6542_v52  ;;  %v5125_v0 = vpop.f32.mrb[12].mxu0 }
 0x1ea   : > { %v3764_v2 = vmax.f32 %v3700_v43, %v3732_v59  ;;  %v3702_v45 = vadd.f32 %v6548_v56, %v3663_v60  ;;  %v5167_v4 = vadd.f32 %v5125_v0, %v6531_v47  ;;  %v3514_v5 = vpop.f32.mrb[13].mxu0 }
 0x1eb   : > { %v3763_v6 = vmax.f32 %v3699_v58, %v3731_v62  ;;  %v3701_v7 = vadd.f32 %v6548_v56, %v3662_v63  ;;  %v5168_v46 = vadd.f32 %v3514_v5, %v6533_v48 }
 0x1ec   : > { %3796 = vst [vmem:[%s6560_s13 + $0x48] sm:$0xff] %v3764_v2  ;;  %v3734_v9 = vmul.f32 0.1, %v3702_v45  ;;  %v3665_v10 = vmul.f32 %v5167_v4, %v6542_v52 }
 0x1ed   : > { %3795 = vst [vmem:[%s6560_s13 + $0x40] sm:$0xff] %v3763_v6  ;;  %v3733_v55 = vmul.f32 0.1, %v3701_v7  ;;  %v3664_v57 = vmul.f32 %v5168_v46, %v6542_v52  ;;  %v5128_v28 = vpop.f32.mrb[14].mxu0 }
 0x1ee   : > { %v3766_v24 = vmax.f32 %v3702_v45, %v3734_v9  ;;  %v3704_v47 = vadd.f32 %v6548_v56, %v3665_v10  ;;  %v5169_v25 = vadd.f32 %v5128_v28, %v6535_v49  ;;  %v3524_v8 = vpop.f32.mrb[15].mxu0 }
 0x1ef   : > { %v3765_v11 = vmax.f32 %v3701_v7, %v3733_v55  ;;  %v3703_v13 = vadd.f32 %v6548_v56, %v3664_v57  ;;  %v5170_v48 = vadd.f32 %v3524_v8, %v6537_v50 }
 0x1f0   : > { %3798 = vst [vmem:[%s6560_s13 + $0x58] sm:$0xff] %v3766_v24  ;;  %v3736_v15 = vmul.f32 0.1, %v3704_v47  ;;  %v3667_v17 = vmul.f32 %v5169_v25, %v6542_v52 }
 0x1f1   : > { %3797 = vst [vmem:[%s6560_s13 + $0x50] sm:$0xff] %v3765_v11  ;;  %v3735_v19 = vmul.f32 0.1, %v3703_v13  ;;  %v3666_v21 = vmul.f32 %v5170_v48, %v6542_v52  ;;  %v4931_v22 = vpop.f32.mrb[16].mxu1  ;;  %v5131_v37 = vpop.f32.mrb[16].mxu0 }
 0x1f2   : > { %v3768_v33 = vmax.f32 %v3704_v47, %v3736_v15  ;;  %v3706_v49 = vadd.f32 %v6548_v56, %v3667_v17  ;;  %v5171_v12 = vadd.f32 %v5131_v37, %v4931_v22  ;;  %v1973_v16 = vpop.f32.mrb[17].mxu1  ;;  %v3534_v20 = vpop.f32.mrb[17].mxu0 }
 0x1f3   : > { %v3767_v1 = vmax.f32 %v3703_v13, %v3735_v19  ;;  %v3705_v50 = vadd.f32 %v6548_v56, %v3666_v21  ;;  %v5172_v3 = vadd.f32 %v3534_v20, %v1973_v16 }
 0x1f4   : > { %3800 = vst [vmem:[%s6560_s13 + $0x68] sm:$0xff] %v3768_v33  ;;  %v3738_v61 = vmul.f32 0.1, %v3706_v49  ;;  %v3669_v14 = vmul.f32 %v5171_v12, %v6542_v52 }
 0x1f5   : > { %3799 = vst [vmem:[%s6560_s13 + $0x60] sm:$0xff] %v3767_v1  ;;  %v3737_v18 = vmul.f32 0.1, %v3705_v50  ;;  %v3668_v23 = vmul.f32 %v5172_v3, %v6542_v52  ;;  %v4934_v26 = vpop.f32.mrb[18].mxu1  ;;  %v5134_v27 = vpop.f32.mrb[18].mxu0 }
 0x1f6   : > { %v3770_v29 = vmax.f32 %v3706_v49, %v3738_v61  ;;  %v3708_v30 = vadd.f32 %v6548_v56, %v3669_v14  ;;  %v5173_v31 = vadd.f32 %v5134_v27, %v4934_v26  ;;  %v1983_v32 = vpop.f32.mrb[19].mxu1  ;;  %v3544_v34 = vpop.f32.mrb[19].mxu0 }
 0x1f7   : > { %v3769_v35 = vmax.f32 %v3705_v50, %v3737_v18  ;;  %v3707_v36 = vadd.f32 %v6548_v56, %v3668_v23  ;;  %v5174_v38 = vadd.f32 %v3544_v34, %v1983_v32 }
 0x1f8   : > { %3802 = vst [vmem:[%s6560_s13 + $0x78] sm:$0xff] %v3770_v29  ;;  %v3740_v39 = vmul.f32 0.1, %v3708_v30  ;;  %v3671_v40 = vmul.f32 %v5173_v31, %v6542_v52 }
 0x1f9   : > { %3801 = vst [vmem:[%s6560_s13 + $0x70] sm:$0xff] %v3769_v35  ;;  %v3739_v41 = vmul.f32 0.1, %v3707_v36  ;;  %v3670_v42 = vmul.f32 %v5174_v38, %v6542_v52  ;;  %v4937_v43 = vpop.f32.mrb[20].mxu1  ;;  %v5137_v51 = vpop.f32.mrb[20].mxu0 }
 0x1fa   : > { %v3772_v53 = vmax.f32 %v3708_v30, %v3740_v39  ;;  %v3710_v54 = vadd.f32 %v6548_v56, %v3671_v40  ;;  %v5175_v58 = vadd.f32 %v5137_v51, %v4937_v43  ;;  %v1993_v44 = vpop.f32.mrb[21].mxu1  ;;  %v3554_v59 = vpop.f32.mrb[21].mxu0 }
 0x1fb   : > { %v3771_v60 = vmax.f32 %v3707_v36, %v3739_v41  ;;  %v3709_v62 = vadd.f32 %v6548_v56, %v3670_v42  ;;  %v5176_v63 = vadd.f32 %v3554_v59, %v1993_v44 }
 0x1fc   : > { %3804 = vst [vmem:[%s6560_s13 + $0x88] sm:$0xff] %v3772_v53  ;;  %v3742_v0 = vmul.f32 0.1, %v3710_v54  ;;  %v3673_v2 = vmul.f32 %v5175_v58, %v6542_v52 }
 0x1fd   : > { %3803 = vst [vmem:[%s6560_s13 + $0x80] sm:$0xff] %v3771_v60  ;;  %v3741_v45 = vmul.f32 0.1, %v3709_v62  ;;  %v3672_v4 = vmul.f32 %v5176_v63, %v6542_v52  ;;  %v4940_v5 = vpop.f32.mrb[22].mxu1  ;;  %v5140_v6 = vpop.f32.mrb[22].mxu0 }
 0x1fe   : > { %v3774_v7 = vmax.f32 %v3710_v54, %v3742_v0  ;;  %v3712_v46 = vadd.f32 %v6548_v56, %v3673_v2  ;;  %v5177_v9 = vadd.f32 %v5140_v6, %v4940_v5  ;;  %v2003_v10 = vpop.f32.mrb[23].mxu1  ;;  %v3564_v55 = vpop.f32.mrb[23].mxu0 }
 0x1ff   : > { %v3773_v57 = vmax.f32 %v3709_v62, %v3741_v45  ;;  %v3711_v28 = vadd.f32 %v6548_v56, %v3672_v4  ;;  %v5178_v24 = vadd.f32 %v3564_v55, %v2003_v10 }
 0x200   : > { %3806 = vst [vmem:[%s6560_s13 + $0x98] sm:$0xff] %v3774_v7  ;;  %v3744_v47 = vmul.f32 0.1, %v3712_v46  ;;  %v3675_v25 = vmul.f32 %v5177_v9, %v6542_v52 }
 0x201   : > { %3805 = vst [vmem:[%s6560_s13 + $0x90] sm:$0xff] %v3773_v57  ;;  %v3743_v8 = vmul.f32 0.1, %v3711_v28  ;;  %v3674_v11 = vmul.f32 %v5178_v24, %v6542_v52  ;;  %v4943_v13 = vpop.f32.mrb[24].mxu1  ;;  %v5143_v48 = vpop.f32.mrb[24].mxu0 }
 0x202   : > { %v3776_v15 = vmax.f32 %v3712_v46, %v3744_v47  ;;  %v3714_v17 = vadd.f32 %v6548_v56, %v3675_v25  ;;  %v5179_v19 = vadd.f32 %v5143_v48, %v4943_v13  ;;  %v2013_v21 = vpop.f32.mrb[25].mxu1  ;;  %v3574_v22 = vpop.f32.mrb[25].mxu0 }
 0x203   : > { %v3775_v37 = vmax.f32 %v3711_v28, %v3743_v8  ;;  %v3713_v33 = vadd.f32 %v6548_v56, %v3674_v11  ;;  %v5180_v49 = vadd.f32 %v3574_v22, %v2013_v21 }
 0x204   : > { %3808 = vst [vmem:[%s6560_s13 + $0xa8] sm:$0xff] %v3776_v15  ;;  %v3746_v12 = vmul.f32 0.1, %v3714_v17  ;;  %v3677_v16 = vmul.f32 %v5179_v19, %v6542_v52 }
 0x205   : > { %3807 = vst [vmem:[%s6560_s13 + $0xa0] sm:$0xff] %v3775_v37  ;;  %v3745_v20 = vmul.f32 0.1, %v3713_v33  ;;  %v3676_v1 = vmul.f32 %v5180_v49, %v6542_v52  ;;  %v4946_v50 = vpop.f32.mrb[26].mxu1  ;;  %v5146_v3 = vpop.f32.mrb[26].mxu0 }
 0x206   : > { %v3778_v61 = vmax.f32 %v3714_v17, %v3746_v12  ;;  %v3716_v14 = vadd.f32 %v6548_v56, %v3677_v16  ;;  %v5181_v18 = vadd.f32 %v5146_v3, %v4946_v50  ;;  %v2023_v23 = vpop.f32.mrb[27].mxu1  ;;  %v3584_v26 = vpop.f32.mrb[27].mxu0 }
 0x207   : > { %v3777_v27 = vmax.f32 %v3713_v33, %v3745_v20  ;;  %v3715_v29 = vadd.f32 %v6548_v56, %v3676_v1  ;;  %v5182_v30 = vadd.f32 %v3584_v26, %v2023_v23 }
 0x208   : > { %3810 = vst [vmem:[%s6560_s13 + $0xb8] sm:$0xff] %v3778_v61  ;;  %v3748_v31 = vmul.f32 0.1, %v3716_v14  ;;  %v3679_v32 = vmul.f32 %v5181_v18, %v6542_v52 }
 0x209   : > { %3809 = vst [vmem:[%s6560_s13 + $0xb0] sm:$0xff] %v3777_v27  ;;  %v3747_v34 = vmul.f32 0.1, %v3715_v29  ;;  %v3678_v35 = vmul.f32 %v5182_v30, %v6542_v52  ;;  %v4949_v36 = vpop.f32.mrb[28].mxu1  ;;  %v5149_v38 = vpop.f32.mrb[28].mxu0 }
 0x20a   : > { %v3780_v39 = vmax.f32 %v3716_v14, %v3748_v31  ;;  %v3718_v40 = vadd.f32 %v6548_v56, %v3679_v32  ;;  %v5183_v41 = vadd.f32 %v5149_v38, %v4949_v36  ;;  %v2033_v42 = vpop.f32.mrb[29].mxu1  ;;  %v3594_v43 = vpop.f32.mrb[29].mxu0 }
 0x20b   : > { %v3779_v51 = vmax.f32 %v3715_v29, %v3747_v34  ;;  %v3717_v53 = vadd.f32 %v6548_v56, %v3678_v35  ;;  %v5184_v54 = vadd.f32 %v3594_v43, %v2033_v42 }
 0x20c   : > { %3812 = vst [vmem:[%s6560_s13 + $0xc8] sm:$0xff] %v3780_v39  ;;  %v3750_v58 = vmul.f32 0.1, %v3718_v40  ;;  %v3681_v44 = vmul.f32 %v5183_v41, %v6542_v52 }
 0x20d   : > { %3811 = vst [vmem:[%s6560_s13 + $0xc0] sm:$0xff] %v3779_v51  ;;  %v3749_v59 = vmul.f32 0.1, %v3717_v53  ;;  %v3680_v60 = vmul.f32 %v5184_v54, %v6542_v52  ;;  %v4952_v62 = vpop.f32.mrb[30].mxu1  ;;  %v5152_v63 = vpop.f32.mrb[30].mxu0 }
 0x20e   : > { %v3782_v0 = vmax.f32 %v3718_v40, %v3750_v58  ;;  %v3720_v2 = vadd.f32 %v6548_v56, %v3681_v44  ;;  %v5185_v45 = vadd.f32 %v5152_v63, %v4952_v62  ;;  %v2043_v4 = vpop.f32.mrb[31].mxu1  ;;  %v3604_v5 = vpop.f32.mrb[31].mxu0 }
 0x20f   : > { %v3781_v6 = vmax.f32 %v3717_v53, %v3749_v59  ;;  %v3719_v7 = vadd.f32 %v6548_v56, %v3680_v60  ;;  %v5186_v46 = vadd.f32 %v3604_v5, %v2043_v4 }
 0x210   : > { %3814 = vst [vmem:[%s6560_s13 + $0xd8] sm:$0xff] %v3782_v0  ;;  %v3752_v9 = vmul.f32 0.1, %v3720_v2  ;;  %v3683_v10 = vmul.f32 %v5185_v45, %v6542_v52 }
 0x211   : > { %3813 = vst [vmem:[%s6560_s13 + $0xd0] sm:$0xff] %v3781_v6  ;;  %v3751_v55 = vmul.f32 0.1, %v3719_v7  ;;  %v3682_v57 = vmul.f32 %v5186_v46, %v6542_v52 }
 0x212   : > { %v3784_v28 = vmax.f32 %v3720_v2, %v3752_v9  ;;  %v3722_v24 = vadd.f32 %v6548_v56, %v3683_v10 }
 0x213   : > { %v3783_v47 = vmax.f32 %v3719_v7, %v3751_v55  ;;  %v3721_v25 = vadd.f32 %v6548_v56, %v3682_v57 }
 0x214   : > { %3816 = vst [vmem:[%s6560_s13 + $0xe8] sm:$0xff] %v3784_v28  ;;  %v3754_v8 = vmul.f32 0.1, %v3722_v24 }
 0x215   : > { %3815 = vst [vmem:[%s6560_s13 + $0xe0] sm:$0xff] %v3783_v47  ;;  %v3753_v11 = vmul.f32 0.1, %v3721_v25 }
 0x216   : > { %v3786_v13 = vmax.f32 %v3722_v24, %v3754_v8 }
 0x217   : > { %v3785_v52 = vmax.f32 %v3721_v25, %v3753_v11 }
 0x218   : > { %3818 = vst [vmem:[%s6560_s13 + $0xf8] sm:$0xff] %v3786_v13 }
 0x219   : > { %3817 = vst [vmem:[%s6560_s13 + $0xf0] sm:$0xff] %v3785_v52 }
 0x21a   : > { %5466 = shalt.err (!%p5463_p3)
}
 0x21b   : > { %s5467_s6 = scalar_lea.hbm %s6660_s27, 4096  ;;  %s5471_s9 = scalar_lea.hbm %s6713_s4, 8192 }
 0x21c   : > { %p5468_p4 = scmp.ne.s32.totalorder %s6660_s27, %s5467_s6  ;;  %p5472_p9 = scmp.lt.u32.totalorder %s6660_s27, %s6713_s4 }
 0x21d   : > { %p5473_p10 = scmp.lt.u32.totalorder %s5471_s9, %s5467_s6  ;;  %p5475_p12 = scmp.lt.u32.totalorder %s5467_s6, %s6660_s27 }
 0x21e   : > { %p5469_p7 = pnand %p5468_p4, %p5583_p5 }
 0x21f   : > { %p5474_p11 = por %p5473_p10, %p5472_p9 }
 0x220   : > { %p5470_p8 = pneg %p5469_p7 }
 0x221   : > { %p5476_p13 = por %p5475_p12, %p5474_p11 }
 0x223   : > { %p5477_p0 = pnand %p5476_p13, %p5470_p8 }
 0x225   : > { %5480 = shalt.err (!%p5477_p0)
}
 0x226   : > { %s5518_s12 = smov 128   ;;  %s5519_s13 = smov 8  }
 0x227   : > { %5412 = dma.vmem_to_hbm [thread:$0]  (%p5583_p5), %s6662_s20, 4096, %s6660_s27, %s6668_s19, %s5518_s12, %s5518_s12, %s5519_s13  }
 0x228 PF: > { %p5418_p1 = scmp.ge.s32.totalorder %s5515_s18, 2  ;;  %s3848_s14 = sand.u32 1, %s5503_s15  }
 0x229   : > { %s3849_s22 = scalar_lea.sflag [#allocation3], %s3848_s14 }
 0x22a   : > { %p5415_p2 = pnand %p5418_p1, %p5587_p6 }
 0x22c   : > { %5498 = dma.done.wait (!%p5415_p2), %s3849_s22, 4096  }
 0x22d   : > { %5500 = vsyncadd (!%p5415_p2), %s3849_s22, 4294963200  ;;  %p14_p3 = scmp.ge.s32.totalorder %s5570_s21, 4   ;;  %s6825_s15 = smov %s5507_s16 }
 0x22e   : > { %s6826_s16 = smov %s5511_s17  ;;  %s6827_s17 = smov %s5581_s24 }
 0x22f   : > { %s6828_s18 = smov %s5570_s21  ;;  %16 = sbr.rel (!%p14_p3) target bundleno = 3 (0x3), region = 81 }
 0x236   :  { %3854 = vsyncpa [#allocation3], 1 }
 0x237   :  { %3856 = vsyncpa [#allocation3 + $0x1], 1 }

</bundles_post_ra>
